<compile_context>
chip_gen: v7x
topology: tpu7x:2x2x1
jax: 0.10.0
libtpu: 0.0.40
codegen_flags: <defaults>
</compile_context>

<pallas_src>
import jax
import jax.numpy as jnp
from jax.experimental import pallas as pl
from jax.experimental.pallas import tpu as pltpu  # noqa: F401  (TPU backend)


def _add3_kernel(x218_ref, x204_ref, x233_ref, out_ref):
    # x219 = x218 + x204 ; x234 = x233 + x219
    out_ref[...] = x233_ref[...] + (x218_ref[...] + x204_ref[...])


def fused_add_add(x218, x204, x233):
    assert x218.shape == x204.shape == x233.shape
    assert x218.dtype == x204.dtype == x233.dtype

    shape = x218.shape
    total = int(x218.size)
    itemsize = jnp.dtype(x218.dtype).itemsize

    # Full-array block in the tensors' NATURAL shape: no wrapper reshapes, so
    # no hidden relayout copies around the call.  The (14,14) minor dims equal
    # the full array dims, which satisfies the (8,128) block constraint.
    full_spec = pl.BlockSpec(shape, lambda: (0,) * len(shape))

    return pl.pallas_call(
        _add3_kernel,
        out_shape=jax.ShapeDtypeStruct(shape, x218.dtype),
        in_specs=[full_spec, full_spec, full_spec],
        out_specs=full_spec,
        # Reuse x233's buffer for the output (3rd input -> output 0).
        input_output_aliases={2: 0},
        cost_estimate=pl.CostEstimate(
            flops=2 * total,
            transcendentals=0,
            bytes_accessed=4 * total * itemsize,  # 3 reads + 1 write
        ),
    )(x218, x204, x233)


# Donate x233 so the in-kernel aliasing is realized instead of degrading to a
# copy-then-alias.  (Safe: x233 has no other consumer in the module graph.)
fused_add_add_jit = jax.jit(fused_add_add, donate_argnums=(2,))


if __name__ == "__main__":
    key = jax.random.PRNGKey(0)
    k1, k2, k3 = jax.random.split(key, 3)

    shape = (1, 112, 14, 14)  # matches the PyTorch module's tensors
    x218 = jax.random.normal(k1, shape, dtype=jnp.float32)
    x204 = jax.random.normal(k2, shape, dtype=jnp.float32)
    x233 = jax.random.normal(k3, shape, dtype=jnp.float32)

    # Reference check (plain JAX) — computed BEFORE the donated call so x233's
    # buffer is still valid when it is read here.
    ref = x233 + (x218 + x204)
    jax.block_until_ready(ref)

    result = fused_add_add_jit(x218, x204, x233)
    jax.block_until_ready(result)

    assert result.shape == shape
    assert jnp.allclose(result, ref, atol=1e-6), "mismatch vs reference"

    print("KERNEL_OK")
</pallas_src>

<mosaic_0001>
module attributes {stable_mosaic.version = 11 : i64} {
  func.func @_add3_kernel(%arg0: memref<1x112x14x14xf32, #tpu.memory_space<vmem>>, %arg1: memref<1x112x14x14xf32, #tpu.memory_space<vmem>>, %arg2: memref<1x112x14x14xf32, #tpu.memory_space<vmem>>, %arg3: memref<1x112x14x14xf32, #tpu.memory_space<vmem>>) attributes {dimension_semantics = [], scalar_prefetch = 0 : i64, scratch_operands = 0 : i64, tpu.core_type = #tpu.core_type<tc>} {
    %c0 = arith.constant 0 : index
    %c0_0 = arith.constant 0 : index
    %c0_1 = arith.constant 0 : index
    %c0_2 = arith.constant 0 : index
    %0 = vector.load %arg2[%c0, %c0_0, %c0_1, %c0_2] : memref<1x112x14x14xf32, #tpu.memory_space<vmem>>, vector<1x112x14x14xf32>
    %c0_3 = arith.constant 0 : index
    %c0_4 = arith.constant 0 : index
    %c0_5 = arith.constant 0 : index
    %c0_6 = arith.constant 0 : index
    %1 = vector.load %arg0[%c0_3, %c0_4, %c0_5, %c0_6] : memref<1x112x14x14xf32, #tpu.memory_space<vmem>>, vector<1x112x14x14xf32>
    %c0_7 = arith.constant 0 : index
    %c0_8 = arith.constant 0 : index
    %c0_9 = arith.constant 0 : index
    %c0_10 = arith.constant 0 : index
    %2 = vector.load %arg1[%c0_7, %c0_8, %c0_9, %c0_10] : memref<1x112x14x14xf32, #tpu.memory_space<vmem>>, vector<1x112x14x14xf32>
    %3 = arith.addf %1, %2 : vector<1x112x14x14xf32>
    %4 = arith.addf %0, %3 : vector<1x112x14x14xf32>
    %c0_11 = arith.constant 0 : index
    %c0_12 = arith.constant 0 : index
    %c0_13 = arith.constant 0 : index
    %c0_14 = arith.constant 0 : index
    %5 = vector.load %arg3[%c0_11, %c0_12, %c0_13, %c0_14] : memref<1x112x14x14xf32, #tpu.memory_space<vmem>>, vector<1x112x14x14xf32>
    tpu.vector_store %arg3[%c0_11, %c0_12, %c0_13, %c0_14], %4 {strides = array<i32>} : memref<1x112x14x14xf32, #tpu.memory_space<vmem>>, vector<1x112x14x14xf32>,
    return
  }
}

</mosaic_0001>

<bundles_post_ra>
// kernel: fused_add_add.1
= control target key start
LH: loop header
LB: loop body
LE: loop exit
PB: predicated region body
PF: predicated region fallthrough
CT: control target
= control target key end

     0   :  { %vm1134_vm0 = vcmask 113664   ;;  %vm1136_vm1 = vcmask 111616   ;;  %s4296_s0 = inlined_call_operand.vmem [shape: f32[1,112,14,14], index: 0, kind: input, shape index: {}]   ;;  %s4297_s1 = inlined_call_operand.vmem [shape: f32[1,112,14,14], index: 1, kind: input, shape index: {}]   ;;  %s4298_s2 = inlined_call_operand.vmem [shape: f32[1,112,14,14], index: 2, kind: input, shape index: {}, may-alias: {2,3}]   ;;  %s4299_s3 = inlined_call_operand.vmem [shape: f32[1,112,14,14], index: 3, kind: output, shape index: {}, may-alias: {2,3}]  }
   0x1   :  { %v14_v0 = vld [vmem:[%s4298_s2] sm:$0xff]  ;;  %v15_v4 = vld [vmem:[%s4298_s2 + $0x8] sm:$0x3f]  ;;  %v16_v8 = vld [vmem:[%s4298_s2 + $0x10] sm:$0xff] }
   0x2   :  { %v238_v1 = vld [vmem:[%s4296_s0] sm:$0xff]  ;;  %v239_v5 = vld [vmem:[%s4296_s0 + $0x8] sm:$0x3f]  ;;  %v240_v9 = vld [vmem:[%s4296_s0 + $0x10] sm:$0xff] }
   0x3   :  { %v462_v2 = vld [vmem:[%s4297_s1] sm:$0xff]  ;;  %v463_v6 = vld [vmem:[%s4297_s1 + $0x8] sm:$0x3f]  ;;  %v464_v10 = vld [vmem:[%s4297_s1 + $0x10] sm:$0xff] }
   0x4   :  { %v686_v3 = vadd.f32 %v462_v2, %v238_v1  ;;  %v687_v7 = vadd.f32 %v463_v6, %v239_v5  ;;  %v688_v12 = vadd.f32 %v464_v10, %v240_v9  ;;  %v17_v13 = vld [vmem:[%s4298_s2 + $0x18] sm:$0x3f]  ;;  %v18_v18 = vld [vmem:[%s4298_s2 + $0x20] sm:$0xff]  ;;  %v243_v24 = vld [vmem:[%s4296_s0 + $0x28] sm:$0x3f] }
   0x5   :  { %v241_v14 = vld [vmem:[%s4296_s0 + $0x18] sm:$0x3f]  ;;  %v242_v19 = vld [vmem:[%s4296_s0 + $0x20] sm:$0xff]  ;;  %v467_v25 = vld [vmem:[%s4297_s1 + $0x28] sm:$0x3f] }
   0x6   :  { %v910_v11 = vadd.f32 %v686_v3, %v14_v0  ;;  %v465_v15 = vld [vmem:[%s4297_s1 + $0x18] sm:$0x3f]  ;;  %v911_v16 = vadd.f32 %v687_v7, %v15_v4  ;;  %v466_v20 = vld [vmem:[%s4297_s1 + $0x20] sm:$0xff]  ;;  %v912_v21 = vadd.f32 %v688_v12, %v16_v8  ;;  %v691_v27 = vadd.f32 %v467_v25, %v243_v24  ;;  %v244_v29 = vld [vmem:[%s4296_s0 + $0x30] sm:$0xff] }
   0x7   :  { %v689_v17 = vadd.f32 %v465_v15, %v241_v14  ;;  %v690_v22 = vadd.f32 %v466_v20, %v242_v19  ;;  %v468_v30 = vld [vmem:[%s4297_s1 + $0x30] sm:$0xff]  ;;  %v245_v34 = vld [vmem:[%s4296_s0 + $0x38] sm:$0x3f]  ;;  %v246_v39 = vld [vmem:[%s4296_s0 + $0x40] sm:$0xff] }
   0x8   :  { %1135 = vst.msk [vmem:[%s4299_s3] sm:$0xff] %vm1134_vm0, %v910_v11  ;;  %v692_v32 = vadd.f32 %v468_v30, %v244_v29  ;;  %v469_v35 = vld [vmem:[%s4297_s1 + $0x38] sm:$0x3f]  ;;  %v470_v40 = vld [vmem:[%s4297_s1 + $0x40] sm:$0xff]  ;;  %v247_v44 = vld [vmem:[%s4296_s0 + $0x48] sm:$0x3f] }
   0x9   :  { %v913_v26 = vadd.f32 %v689_v17, %v17_v13  ;;  %v914_v31 = vadd.f32 %v690_v22, %v18_v18  ;;  %v693_v37 = vadd.f32 %v469_v35, %v245_v34  ;;  %v694_v42 = vadd.f32 %v470_v40, %v246_v39  ;;  %v471_v45 = vld [vmem:[%s4297_s1 + $0x48] sm:$0x3f]  ;;  %v248_v49 = vld [vmem:[%s4296_s0 + $0x50] sm:$0xff]  ;;  %v249_v54 = vld [vmem:[%s4296_s0 + $0x58] sm:$0x3f] }
   0xa   :  { %v695_v47 = vadd.f32 %v471_v45, %v247_v44  ;;  %v472_v50 = vld [vmem:[%s4297_s1 + $0x50] sm:$0xff]  ;;  %v473_v55 = vld [vmem:[%s4297_s1 + $0x58] sm:$0x3f]  ;;  %v250_v59 = vld [vmem:[%s4296_s0 + $0x60] sm:$0xff] }
   0xb   :  { %v696_v52 = vadd.f32 %v472_v50, %v248_v49  ;;  %v697_v57 = vadd.f32 %v473_v55, %v249_v54  ;;  %v474_v60 = vld [vmem:[%s4297_s1 + $0x60] sm:$0xff]  ;;  %v251_v0 = vld [vmem:[%s4296_s0 + $0x68] sm:$0x3f]  ;;  %v252_v5 = vld [vmem:[%s4296_s0 + $0x70] sm:$0xff] }
   0xc   :  { %v698_v62 = vadd.f32 %v474_v60, %v250_v59  ;;  %v475_v1 = vld [vmem:[%s4297_s1 + $0x68] sm:$0x3f]  ;;  %v476_v6 = vld [vmem:[%s4297_s1 + $0x70] sm:$0xff]  ;;  %v253_v10 = vld [vmem:[%s4296_s0 + $0x78] sm:$0x3f] }
   0xd   :  { %v699_v3 = vadd.f32 %v475_v1, %v251_v0  ;;  %v700_v8 = vadd.f32 %v476_v6, %v252_v5  ;;  %v477_v11 = vld [vmem:[%s4297_s1 + $0x78] sm:$0x3f]  ;;  %v254_v15 = vld [vmem:[%s4296_s0 + $0x80] sm:$0xff]  ;;  %v255_v20 = vld [vmem:[%s4296_s0 + $0x88] sm:$0x3f] }
   0xe   :  { %v701_v13 = vadd.f32 %v477_v11, %v253_v10  ;;  %v256_v25 = vld [vmem:[%s4296_s0 + $0x90] sm:$0xff]  ;;  %v257_v30 = vld [vmem:[%s4296_s0 + $0x98] sm:$0x3f]  ;;  %v258_v35 = vld [vmem:[%s4296_s0 + $0xa0] sm:$0xff] }
   0xf   :  { %v19_v23 = vld [vmem:[%s4298_s2 + $0x28] sm:$0x3f]  ;;  %v260_v45 = vld [vmem:[%s4296_s0 + $0xb0] sm:$0xff]  ;;  %v261_v50 = vld [vmem:[%s4296_s0 + $0xb8] sm:$0x3f] }
  0x10   :  { %1137 = vst.msk [vmem:[%s4299_s3 + $0x8] sm:$0x3f] %vm1136_vm1, %v911_v16  ;;  %v915_v36 = vadd.f32 %v691_v27, %v19_v23  ;;  %v478_v16 = vld [vmem:[%s4297_s1 + $0x80] sm:$0xff]  ;;  %v259_v40 = vld [vmem:[%s4296_s0 + $0xa8] sm:$0x3f]  ;;  %v264_v1 = vld [vmem:[%s4296_s0 + $0xd0] sm:$0xff] }
  0x11   :  { %v702_v18 = vadd.f32 %v478_v16, %v254_v15  ;;  %v262_v55 = vld [vmem:[%s4296_s0 + $0xc0] sm:$0xff]  ;;  %v263_v60 = vld [vmem:[%s4296_s0 + $0xc8] sm:$0x3f]  ;;  %v265_v6 = vld [vmem:[%s4296_s0 + $0xd8] sm:$0x3f] }
  0x12   :  { %v266_v11 = vld [vmem:[%s4296_s0 + $0xe0] sm:$0xff]  ;;  %v267_v16 = vld [vmem:[%s4296_s0 + $0xe8] sm:$0x3f] }
  0x17   :  { %v20_v28 = vld [vmem:[%s4298_s2 + $0x30] sm:$0xff] }
  0x18   :  { %1138 = vst.msk [vmem:[%s4299_s3 + $0x10] sm:$0xff] %vm1134_vm0, %v912_v21  ;;  %v916_v41 = vadd.f32 %v692_v32, %v20_v28  ;;  %v479_v21 = vld [vmem:[%s4297_s1 + $0x88] sm:$0x3f] }
  0x19   :  { %v703_v23 = vadd.f32 %v479_v21, %v255_v20  ;;  %v268_v21 = vld [vmem:[%s4296_s0 + $0xf0] sm:$0xff] }
  0x1f   :  { %v21_v33 = vld [vmem:[%s4298_s2 + $0x38] sm:$0x3f] }
  0x20   :  { %1139 = vst.msk [vmem:[%s4299_s3 + $0x18] sm:$0x3f] %vm1136_vm1, %v913_v26  ;;  %v917_v46 = vadd.f32 %v693_v37, %v21_v33  ;;  %v480_v26 = vld [vmem:[%s4297_s1 + $0x90] sm:$0xff] }
  0x21   :  { %v704_v28 = vadd.f32 %v480_v26, %v256_v25  ;;  %v269_v26 = vld [vmem:[%s4296_s0 + $0xf8] sm:$0x3f] }
  0x27   :  { %v22_v38 = vld [vmem:[%s4298_s2 + $0x40] sm:$0xff] }
  0x28   :  { %1140 = vst.msk [vmem:[%s4299_s3 + $0x20] sm:$0xff] %vm1134_vm0, %v914_v31  ;;  %v918_v51 = vadd.f32 %v694_v42, %v22_v38  ;;  %v481_v31 = vld [vmem:[%s4297_s1 + $0x98] sm:$0x3f] }
  0x29   :  { %v705_v33 = vadd.f32 %v481_v31, %v257_v30  ;;  %v270_v31 = vld [vmem:[%s4296_s0 + $0x100] sm:$0xff] }
  0x2f   :  { %v23_v43 = vld [vmem:[%s4298_s2 + $0x48] sm:$0x3f] }
  0x30   :  { %1141 = vst.msk [vmem:[%s4299_s3 + $0x28] sm:$0x3f] %vm1136_vm1, %v915_v36  ;;  %v919_v56 = vadd.f32 %v695_v47, %v23_v43  ;;  %v482_v36 = vld [vmem:[%s4297_s1 + $0xa0] sm:$0xff] }
  0x31   :  { %v706_v38 = vadd.f32 %v482_v36, %v258_v35  ;;  %v271_v36 = vld [vmem:[%s4296_s0 + $0x108] sm:$0x3f] }
  0x37   :  { %v24_v48 = vld [vmem:[%s4298_s2 + $0x50] sm:$0xff] }
  0x38   :  { %1142 = vst.msk [vmem:[%s4299_s3 + $0x30] sm:$0xff] %vm1134_vm0, %v916_v41  ;;  %v920_v61 = vadd.f32 %v696_v52, %v24_v48  ;;  %v483_v41 = vld [vmem:[%s4297_s1 + $0xa8] sm:$0x3f] }
  0x39   :  { %v707_v43 = vadd.f32 %v483_v41, %v259_v40  ;;  %v272_v41 = vld [vmem:[%s4296_s0 + $0x110] sm:$0xff] }
  0x3f   :  { %v25_v53 = vld [vmem:[%s4298_s2 + $0x58] sm:$0x3f] }
  0x40   :  { %1143 = vst.msk [vmem:[%s4299_s3 + $0x38] sm:$0x3f] %vm1136_vm1, %v917_v46  ;;  %v921_v2 = vadd.f32 %v697_v57, %v25_v53  ;;  %v484_v46 = vld [vmem:[%s4297_s1 + $0xb0] sm:$0xff] }
  0x41   :  { %v708_v48 = vadd.f32 %v484_v46, %v260_v45  ;;  %v273_v46 = vld [vmem:[%s4296_s0 + $0x118] sm:$0x3f] }
  0x47   :  { %v26_v58 = vld [vmem:[%s4298_s2 + $0x60] sm:$0xff] }
  0x48   :  { %1144 = vst.msk [vmem:[%s4299_s3 + $0x40] sm:$0xff] %vm1134_vm0, %v918_v51  ;;  %v922_v7 = vadd.f32 %v698_v62, %v26_v58  ;;  %v485_v51 = vld [vmem:[%s4297_s1 + $0xb8] sm:$0x3f] }
  0x49   :  { %v709_v53 = vadd.f32 %v485_v51, %v261_v50  ;;  %v274_v51 = vld [vmem:[%s4296_s0 + $0x120] sm:$0xff] }
  0x4f   :  { %v27_v63 = vld [vmem:[%s4298_s2 + $0x68] sm:$0x3f] }
  0x50   :  { %1145 = vst.msk [vmem:[%s4299_s3 + $0x48] sm:$0x3f] %vm1136_vm1, %v919_v56  ;;  %v923_v12 = vadd.f32 %v699_v3, %v27_v63  ;;  %v486_v56 = vld [vmem:[%s4297_s1 + $0xc0] sm:$0xff] }
  0x51   :  { %v710_v58 = vadd.f32 %v486_v56, %v262_v55  ;;  %v275_v56 = vld [vmem:[%s4296_s0 + $0x128] sm:$0x3f] }
  0x57   :  { %v28_v4 = vld [vmem:[%s4298_s2 + $0x70] sm:$0xff] }
  0x58   :  { %1146 = vst.msk [vmem:[%s4299_s3 + $0x50] sm:$0xff] %vm1134_vm0, %v920_v61  ;;  %v924_v17 = vadd.f32 %v700_v8, %v28_v4  ;;  %v487_v61 = vld [vmem:[%s4297_s1 + $0xc8] sm:$0x3f] }
  0x59   :  { %v711_v63 = vadd.f32 %v487_v61, %v263_v60  ;;  %v276_v61 = vld [vmem:[%s4296_s0 + $0x130] sm:$0xff] }
  0x5f   :  { %v29_v9 = vld [vmem:[%s4298_s2 + $0x78] sm:$0x3f] }
  0x60   :  { %1147 = vst.msk [vmem:[%s4299_s3 + $0x58] sm:$0x3f] %vm1136_vm1, %v921_v2  ;;  %v925_v22 = vadd.f32 %v701_v13, %v29_v9  ;;  %v488_v2 = vld [vmem:[%s4297_s1 + $0xd0] sm:$0xff] }
  0x61   :  { %v712_v4 = vadd.f32 %v488_v2, %v264_v1  ;;  %v277_v2 = vld [vmem:[%s4296_s0 + $0x138] sm:$0x3f] }
  0x67   :  { %v30_v14 = vld [vmem:[%s4298_s2 + $0x80] sm:$0xff] }
  0x68   :  { %1148 = vst.msk [vmem:[%s4299_s3 + $0x60] sm:$0xff] %vm1134_vm0, %v922_v7  ;;  %v926_v27 = vadd.f32 %v702_v18, %v30_v14  ;;  %v489_v7 = vld [vmem:[%s4297_s1 + $0xd8] sm:$0x3f] }
  0x69   :  { %v713_v9 = vadd.f32 %v489_v7, %v265_v6  ;;  %v278_v7 = vld [vmem:[%s4296_s0 + $0x140] sm:$0xff] }
  0x6f   :  { %v31_v19 = vld [vmem:[%s4298_s2 + $0x88] sm:$0x3f] }
  0x70   :  { %1149 = vst.msk [vmem:[%s4299_s3 + $0x68] sm:$0x3f] %vm1136_vm1, %v923_v12  ;;  %v927_v32 = vadd.f32 %v703_v23, %v31_v19  ;;  %v490_v12 = vld [vmem:[%s4297_s1 + $0xe0] sm:$0xff] }
  0x71   :  { %v714_v14 = vadd.f32 %v490_v12, %v266_v11  ;;  %v279_v12 = vld [vmem:[%s4296_s0 + $0x148] sm:$0x3f] }
  0x77   :  { %v32_v24 = vld [vmem:[%s4298_s2 + $0x90] sm:$0xff] }
  0x78   :  { %1150 = vst.msk [vmem:[%s4299_s3 + $0x70] sm:$0xff] %vm1134_vm0, %v924_v17  ;;  %v928_v37 = vadd.f32 %v704_v28, %v32_v24  ;;  %v491_v17 = vld [vmem:[%s4297_s1 + $0xe8] sm:$0x3f] }
  0x79   :  { %v715_v19 = vadd.f32 %v491_v17, %v267_v16  ;;  %v280_v17 = vld [vmem:[%s4296_s0 + $0x150] sm:$0xff] }
  0x7f   :  { %v33_v29 = vld [vmem:[%s4298_s2 + $0x98] sm:$0x3f] }
  0x80   :  { %1151 = vst.msk [vmem:[%s4299_s3 + $0x78] sm:$0x3f] %vm1136_vm1, %v925_v22  ;;  %v929_v42 = vadd.f32 %v705_v33, %v33_v29  ;;  %v492_v22 = vld [vmem:[%s4297_s1 + $0xf0] sm:$0xff] }
  0x81   :  { %v716_v24 = vadd.f32 %v492_v22, %v268_v21  ;;  %v281_v22 = vld [vmem:[%s4296_s0 + $0x158] sm:$0x3f] }
  0x87   :  { %v34_v34 = vld [vmem:[%s4298_s2 + $0xa0] sm:$0xff] }
  0x88   :  { %1152 = vst.msk [vmem:[%s4299_s3 + $0x80] sm:$0xff] %vm1134_vm0, %v926_v27  ;;  %v930_v47 = vadd.f32 %v706_v38, %v34_v34  ;;  %v493_v27 = vld [vmem:[%s4297_s1 + $0xf8] sm:$0x3f] }
  0x89   :  { %v717_v29 = vadd.f32 %v493_v27, %v269_v26  ;;  %v282_v27 = vld [vmem:[%s4296_s0 + $0x160] sm:$0xff] }
  0x8f   :  { %v35_v39 = vld [vmem:[%s4298_s2 + $0xa8] sm:$0x3f] }
  0x90   :  { %1153 = vst.msk [vmem:[%s4299_s3 + $0x88] sm:$0x3f] %vm1136_vm1, %v927_v32  ;;  %v931_v52 = vadd.f32 %v707_v43, %v35_v39  ;;  %v494_v32 = vld [vmem:[%s4297_s1 + $0x100] sm:$0xff] }
  0x91   :  { %v718_v34 = vadd.f32 %v494_v32, %v270_v31  ;;  %v283_v32 = vld [vmem:[%s4296_s0 + $0x168] sm:$0x3f] }
  0x97   :  { %v36_v44 = vld [vmem:[%s4298_s2 + $0xb0] sm:$0xff] }
  0x98   :  { %1154 = vst.msk [vmem:[%s4299_s3 + $0x90] sm:$0xff] %vm1134_vm0, %v928_v37  ;;  %v932_v57 = vadd.f32 %v708_v48, %v36_v44  ;;  %v495_v37 = vld [vmem:[%s4297_s1 + $0x108] sm:$0x3f] }
  0x99   :  { %v719_v39 = vadd.f32 %v495_v37, %v271_v36  ;;  %v284_v37 = vld [vmem:[%s4296_s0 + $0x170] sm:$0xff] }
  0x9f   :  { %v37_v49 = vld [vmem:[%s4298_s2 + $0xb8] sm:$0x3f] }
  0xa0   :  { %1155 = vst.msk [vmem:[%s4299_s3 + $0x98] sm:$0x3f] %vm1136_vm1, %v929_v42  ;;  %v933_v62 = vadd.f32 %v709_v53, %v37_v49  ;;  %v496_v42 = vld [vmem:[%s4297_s1 + $0x110] sm:$0xff] }
  0xa1   :  { %v720_v44 = vadd.f32 %v496_v42, %v272_v41  ;;  %v285_v42 = vld [vmem:[%s4296_s0 + $0x178] sm:$0x3f] }
  0xa7   :  { %v38_v54 = vld [vmem:[%s4298_s2 + $0xc0] sm:$0xff] }
  0xa8   :  { %1156 = vst.msk [vmem:[%s4299_s3 + $0xa0] sm:$0xff] %vm1134_vm0, %v930_v47  ;;  %v934_v3 = vadd.f32 %v710_v58, %v38_v54  ;;  %v497_v47 = vld [vmem:[%s4297_s1 + $0x118] sm:$0x3f] }
  0xa9   :  { %v721_v49 = vadd.f32 %v497_v47, %v273_v46  ;;  %v286_v47 = vld [vmem:[%s4296_s0 + $0x180] sm:$0xff] }
  0xaf   :  { %v39_v59 = vld [vmem:[%s4298_s2 + $0xc8] sm:$0x3f] }
  0xb0   :  { %1157 = vst.msk [vmem:[%s4299_s3 + $0xa8] sm:$0x3f] %vm1136_vm1, %v931_v52  ;;  %v935_v8 = vadd.f32 %v711_v63, %v39_v59  ;;  %v498_v52 = vld [vmem:[%s4297_s1 + $0x120] sm:$0xff] }
  0xb1   :  { %v722_v54 = vadd.f32 %v498_v52, %v274_v51  ;;  %v287_v52 = vld [vmem:[%s4296_s0 + $0x188] sm:$0x3f] }
  0xb7   :  { %v40_v0 = vld [vmem:[%s4298_s2 + $0xd0] sm:$0xff] }
  0xb8   :  { %1158 = vst.msk [vmem:[%s4299_s3 + $0xb0] sm:$0xff] %vm1134_vm0, %v932_v57  ;;  %v936_v13 = vadd.f32 %v712_v4, %v40_v0  ;;  %v499_v57 = vld [vmem:[%s4297_s1 + $0x128] sm:$0x3f] }
  0xb9   :  { %v723_v59 = vadd.f32 %v499_v57, %v275_v56  ;;  %v288_v57 = vld [vmem:[%s4296_s0 + $0x190] sm:$0xff] }
  0xbf   :  { %v41_v5 = vld [vmem:[%s4298_s2 + $0xd8] sm:$0x3f] }
  0xc0   :  { %1159 = vst.msk [vmem:[%s4299_s3 + $0xb8] sm:$0x3f] %vm1136_vm1, %v933_v62  ;;  %v937_v18 = vadd.f32 %v713_v9, %v41_v5  ;;  %v500_v62 = vld [vmem:[%s4297_s1 + $0x130] sm:$0xff] }
  0xc1   :  { %v724_v0 = vadd.f32 %v500_v62, %v276_v61  ;;  %v289_v62 = vld [vmem:[%s4296_s0 + $0x198] sm:$0x3f] }
  0xc7   :  { %v42_v10 = vld [vmem:[%s4298_s2 + $0xe0] sm:$0xff] }
  0xc8   :  { %1160 = vst.msk [vmem:[%s4299_s3 + $0xc0] sm:$0xff] %vm1134_vm0, %v934_v3  ;;  %v938_v23 = vadd.f32 %v714_v14, %v42_v10  ;;  %v501_v3 = vld [vmem:[%s4297_s1 + $0x138] sm:$0x3f] }
  0xc9   :  { %v725_v5 = vadd.f32 %v501_v3, %v277_v2  ;;  %v290_v3 = vld [vmem:[%s4296_s0 + $0x1a0] sm:$0xff] }
  0xcf   :  { %v43_v15 = vld [vmem:[%s4298_s2 + $0xe8] sm:$0x3f] }
  0xd0   :  { %1161 = vst.msk [vmem:[%s4299_s3 + $0xc8] sm:$0x3f] %vm1136_vm1, %v935_v8  ;;  %v939_v28 = vadd.f32 %v715_v19, %v43_v15  ;;  %v502_v8 = vld [vmem:[%s4297_s1 + $0x140] sm:$0xff] }
  0xd1   :  { %v726_v10 = vadd.f32 %v502_v8, %v278_v7  ;;  %v291_v8 = vld [vmem:[%s4296_s0 + $0x1a8] sm:$0x3f] }
  0xd7   :  { %v44_v20 = vld [vmem:[%s4298_s2 + $0xf0] sm:$0xff] }
  0xd8   :  { %1162 = vst.msk [vmem:[%s4299_s3 + $0xd0] sm:$0xff] %vm1134_vm0, %v936_v13  ;;  %v940_v33 = vadd.f32 %v716_v24, %v44_v20  ;;  %v503_v13 = vld [vmem:[%s4297_s1 + $0x148] sm:$0x3f] }
  0xd9   :  { %v727_v15 = vadd.f32 %v503_v13, %v279_v12  ;;  %v292_v13 = vld [vmem:[%s4296_s0 + $0x1b0] sm:$0xff] }
  0xdf   :  { %v45_v25 = vld [vmem:[%s4298_s2 + $0xf8] sm:$0x3f] }
  0xe0   :  { %1163 = vst.msk [vmem:[%s4299_s3 + $0xd8] sm:$0x3f] %vm1136_vm1, %v937_v18  ;;  %v941_v38 = vadd.f32 %v717_v29, %v45_v25  ;;  %v504_v18 = vld [vmem:[%s4297_s1 + $0x150] sm:$0xff] }
  0xe1   :  { %v728_v20 = vadd.f32 %v504_v18, %v280_v17  ;;  %v293_v18 = vld [vmem:[%s4296_s0 + $0x1b8] sm:$0x3f] }
  0xe7   :  { %v46_v30 = vld [vmem:[%s4298_s2 + $0x100] sm:$0xff] }
  0xe8   :  { %1164 = vst.msk [vmem:[%s4299_s3 + $0xe0] sm:$0xff] %vm1134_vm0, %v938_v23  ;;  %v942_v43 = vadd.f32 %v718_v34, %v46_v30  ;;  %v505_v23 = vld [vmem:[%s4297_s1 + $0x158] sm:$0x3f] }
  0xe9   :  { %v729_v25 = vadd.f32 %v505_v23, %v281_v22  ;;  %v294_v23 = vld [vmem:[%s4296_s0 + $0x1c0] sm:$0xff] }
  0xef   :  { %v47_v35 = vld [vmem:[%s4298_s2 + $0x108] sm:$0x3f] }
  0xf0   :  { %1165 = vst.msk [vmem:[%s4299_s3 + $0xe8] sm:$0x3f] %vm1136_vm1, %v939_v28  ;;  %v943_v48 = vadd.f32 %v719_v39, %v47_v35  ;;  %v506_v28 = vld [vmem:[%s4297_s1 + $0x160] sm:$0xff] }
  0xf1   :  { %v730_v30 = vadd.f32 %v506_v28, %v282_v27  ;;  %v295_v28 = vld [vmem:[%s4296_s0 + $0x1c8] sm:$0x3f] }
  0xf7   :  { %v48_v40 = vld [vmem:[%s4298_s2 + $0x110] sm:$0xff] }
  0xf8   :  { %1166 = vst.msk [vmem:[%s4299_s3 + $0xf0] sm:$0xff] %vm1134_vm0, %v940_v33  ;;  %v944_v53 = vadd.f32 %v720_v44, %v48_v40  ;;  %v507_v33 = vld [vmem:[%s4297_s1 + $0x168] sm:$0x3f] }
  0xf9   :  { %v731_v35 = vadd.f32 %v507_v33, %v283_v32  ;;  %v296_v33 = vld [vmem:[%s4296_s0 + $0x1d0] sm:$0xff] }
  0xff   :  { %v49_v45 = vld [vmem:[%s4298_s2 + $0x118] sm:$0x3f] }
 0x100   :  { %1167 = vst.msk [vmem:[%s4299_s3 + $0xf8] sm:$0x3f] %vm1136_vm1, %v941_v38  ;;  %v945_v58 = vadd.f32 %v721_v49, %v49_v45  ;;  %v508_v38 = vld [vmem:[%s4297_s1 + $0x170] sm:$0xff] }
 0x101   :  { %v732_v40 = vadd.f32 %v508_v38, %v284_v37  ;;  %v297_v38 = vld [vmem:[%s4296_s0 + $0x1d8] sm:$0x3f] }
 0x107   :  { %v50_v50 = vld [vmem:[%s4298_s2 + $0x120] sm:$0xff] }
 0x108   :  { %1168 = vst.msk [vmem:[%s4299_s3 + $0x100] sm:$0xff] %vm1134_vm0, %v942_v43  ;;  %v946_v63 = vadd.f32 %v722_v54, %v50_v50  ;;  %v509_v43 = vld [vmem:[%s4297_s1 + $0x178] sm:$0x3f] }
 0x109   :  { %v733_v45 = vadd.f32 %v509_v43, %v285_v42  ;;  %v298_v43 = vld [vmem:[%s4296_s0 + $0x1e0] sm:$0xff] }
 0x10f   :  { %v51_v55 = vld [vmem:[%s4298_s2 + $0x128] sm:$0x3f] }
 0x110   :  { %1169 = vst.msk [vmem:[%s4299_s3 + $0x108] sm:$0x3f] %vm1136_vm1, %v943_v48  ;;  %v947_v4 = vadd.f32 %v723_v59, %v51_v55  ;;  %v510_v48 = vld [vmem:[%s4297_s1 + $0x180] sm:$0xff] }
 0x111   :  { %v734_v50 = vadd.f32 %v510_v48, %v286_v47  ;;  %v299_v48 = vld [vmem:[%s4296_s0 + $0x1e8] sm:$0x3f] }
 0x117   :  { %v52_v60 = vld [vmem:[%s4298_s2 + $0x130] sm:$0xff] }
 0x118   :  { %1170 = vst.msk [vmem:[%s4299_s3 + $0x110] sm:$0xff] %vm1134_vm0, %v944_v53  ;;  %v948_v9 = vadd.f32 %v724_v0, %v52_v60  ;;  %v511_v53 = vld [vmem:[%s4297_s1 + $0x188] sm:$0x3f] }
 0x119   :  { %v735_v55 = vadd.f32 %v511_v53, %v287_v52  ;;  %v300_v53 = vld [vmem:[%s4296_s0 + $0x1f0] sm:$0xff] }
 0x11f   :  { %v53_v1 = vld [vmem:[%s4298_s2 + $0x138] sm:$0x3f] }
 0x120   :  { %1171 = vst.msk [vmem:[%s4299_s3 + $0x118] sm:$0x3f] %vm1136_vm1, %v945_v58  ;;  %v949_v14 = vadd.f32 %v725_v5, %v53_v1  ;;  %v512_v58 = vld [vmem:[%s4297_s1 + $0x190] sm:$0xff] }
 0x121   :  { %v736_v60 = vadd.f32 %v512_v58, %v288_v57  ;;  %v301_v58 = vld [vmem:[%s4296_s0 + $0x1f8] sm:$0x3f] }
 0x127   :  { %v54_v6 = vld [vmem:[%s4298_s2 + $0x140] sm:$0xff] }
 0x128   :  { %1172 = vst.msk [vmem:[%s4299_s3 + $0x120] sm:$0xff] %vm1134_vm0, %v946_v63  ;;  %v950_v19 = vadd.f32 %v726_v10, %v54_v6  ;;  %v513_v63 = vld [vmem:[%s4297_s1 + $0x198] sm:$0x3f] }
 0x129   :  { %v737_v1 = vadd.f32 %v513_v63, %v289_v62  ;;  %v302_v63 = vld [vmem:[%s4296_s0 + $0x200] sm:$0xff] }
 0x12f   :  { %v55_v11 = vld [vmem:[%s4298_s2 + $0x148] sm:$0x3f] }
 0x130   :  { %1173 = vst.msk [vmem:[%s4299_s3 + $0x128] sm:$0x3f] %vm1136_vm1, %v947_v4  ;;  %v951_v24 = vadd.f32 %v727_v15, %v55_v11  ;;  %v514_v4 = vld [vmem:[%s4297_s1 + $0x1a0] sm:$0xff] }
 0x131   :  { %v738_v6 = vadd.f32 %v514_v4, %v290_v3  ;;  %v303_v4 = vld [vmem:[%s4296_s0 + $0x208] sm:$0x3f] }
 0x137   :  { %v56_v16 = vld [vmem:[%s4298_s2 + $0x150] sm:$0xff] }
 0x138   :  { %1174 = vst.msk [vmem:[%s4299_s3 + $0x130] sm:$0xff] %vm1134_vm0, %v948_v9  ;;  %v952_v29 = vadd.f32 %v728_v20, %v56_v16  ;;  %v515_v9 = vld [vmem:[%s4297_s1 + $0x1a8] sm:$0x3f] }
 0x139   :  { %v739_v11 = vadd.f32 %v515_v9, %v291_v8  ;;  %v304_v9 = vld [vmem:[%s4296_s0 + $0x210] sm:$0xff] }
 0x13f   :  { %v57_v21 = vld [vmem:[%s4298_s2 + $0x158] sm:$0x3f] }
 0x140   :  { %1175 = vst.msk [vmem:[%s4299_s3 + $0x138] sm:$0x3f] %vm1136_vm1, %v949_v14  ;;  %v953_v34 = vadd.f32 %v729_v25, %v57_v21  ;;  %v516_v14 = vld [vmem:[%s4297_s1 + $0x1b0] sm:$0xff] }
 0x141   :  { %v740_v16 = vadd.f32 %v516_v14, %v292_v13  ;;  %v305_v14 = vld [vmem:[%s4296_s0 + $0x218] sm:$0x3f] }
 0x147   :  { %v58_v26 = vld [vmem:[%s4298_s2 + $0x160] sm:$0xff] }
 0x148   :  { %1176 = vst.msk [vmem:[%s4299_s3 + $0x140] sm:$0xff] %vm1134_vm0, %v950_v19  ;;  %v954_v39 = vadd.f32 %v730_v30, %v58_v26  ;;  %v517_v19 = vld [vmem:[%s4297_s1 + $0x1b8] sm:$0x3f] }
 0x149   :  { %v741_v21 = vadd.f32 %v517_v19, %v293_v18  ;;  %v306_v19 = vld [vmem:[%s4296_s0 + $0x220] sm:$0xff] }
 0x14f   :  { %v59_v31 = vld [vmem:[%s4298_s2 + $0x168] sm:$0x3f] }
 0x150   :  { %1177 = vst.msk [vmem:[%s4299_s3 + $0x148] sm:$0x3f] %vm1136_vm1, %v951_v24  ;;  %v955_v44 = vadd.f32 %v731_v35, %v59_v31  ;;  %v518_v24 = vld [vmem:[%s4297_s1 + $0x1c0] sm:$0xff] }
 0x151   :  { %v742_v26 = vadd.f32 %v518_v24, %v294_v23  ;;  %v307_v24 = vld [vmem:[%s4296_s0 + $0x228] sm:$0x3f] }
 0x157   :  { %v60_v36 = vld [vmem:[%s4298_s2 + $0x170] sm:$0xff] }
 0x158   :  { %1178 = vst.msk [vmem:[%s4299_s3 + $0x150] sm:$0xff] %vm1134_vm0, %v952_v29  ;;  %v956_v49 = vadd.f32 %v732_v40, %v60_v36  ;;  %v519_v29 = vld [vmem:[%s4297_s1 + $0x1c8] sm:$0x3f] }
 0x159   :  { %v743_v31 = vadd.f32 %v519_v29, %v295_v28  ;;  %v308_v29 = vld [vmem:[%s4296_s0 + $0x230] sm:$0xff] }
 0x15f   :  { %v61_v41 = vld [vmem:[%s4298_s2 + $0x178] sm:$0x3f] }
 0x160   :  { %1179 = vst.msk [vmem:[%s4299_s3 + $0x158] sm:$0x3f] %vm1136_vm1, %v953_v34  ;;  %v957_v54 = vadd.f32 %v733_v45, %v61_v41  ;;  %v520_v34 = vld [vmem:[%s4297_s1 + $0x1d0] sm:$0xff] }
 0x161   :  { %v744_v36 = vadd.f32 %v520_v34, %v296_v33  ;;  %v309_v34 = vld [vmem:[%s4296_s0 + $0x238] sm:$0x3f] }
 0x167   :  { %v62_v46 = vld [vmem:[%s4298_s2 + $0x180] sm:$0xff] }
 0x168   :  { %1180 = vst.msk [vmem:[%s4299_s3 + $0x160] sm:$0xff] %vm1134_vm0, %v954_v39  ;;  %v958_v59 = vadd.f32 %v734_v50, %v62_v46  ;;  %v521_v39 = vld [vmem:[%s4297_s1 + $0x1d8] sm:$0x3f] }
 0x169   :  { %v745_v41 = vadd.f32 %v521_v39, %v297_v38  ;;  %v310_v39 = vld [vmem:[%s4296_s0 + $0x240] sm:$0xff] }
 0x16f   :  { %v63_v51 = vld [vmem:[%s4298_s2 + $0x188] sm:$0x3f] }
 0x170   :  { %1181 = vst.msk [vmem:[%s4299_s3 + $0x168] sm:$0x3f] %vm1136_vm1, %v955_v44  ;;  %v959_v0 = vadd.f32 %v735_v55, %v63_v51  ;;  %v522_v44 = vld [vmem:[%s4297_s1 + $0x1e0] sm:$0xff] }
 0x171   :  { %v746_v46 = vadd.f32 %v522_v44, %v298_v43  ;;  %v311_v44 = vld [vmem:[%s4296_s0 + $0x248] sm:$0x3f] }
 0x177   :  { %v64_v56 = vld [vmem:[%s4298_s2 + $0x190] sm:$0xff] }
 0x178   :  { %1182 = vst.msk [vmem:[%s4299_s3 + $0x170] sm:$0xff] %vm1134_vm0, %v956_v49  ;;  %v960_v5 = vadd.f32 %v736_v60, %v64_v56  ;;  %v523_v49 = vld [vmem:[%s4297_s1 + $0x1e8] sm:$0x3f] }
 0x179   :  { %v747_v51 = vadd.f32 %v523_v49, %v299_v48  ;;  %v312_v49 = vld [vmem:[%s4296_s0 + $0x250] sm:$0xff] }
 0x17f   :  { %v65_v61 = vld [vmem:[%s4298_s2 + $0x198] sm:$0x3f] }
 0x180   :  { %1183 = vst.msk [vmem:[%s4299_s3 + $0x178] sm:$0x3f] %vm1136_vm1, %v957_v54  ;;  %v961_v10 = vadd.f32 %v737_v1, %v65_v61  ;;  %v524_v54 = vld [vmem:[%s4297_s1 + $0x1f0] sm:$0xff] }
 0x181   :  { %v748_v56 = vadd.f32 %v524_v54, %v300_v53  ;;  %v313_v54 = vld [vmem:[%s4296_s0 + $0x258] sm:$0x3f] }
 0x187   :  { %v66_v2 = vld [vmem:[%s4298_s2 + $0x1a0] sm:$0xff] }
 0x188   :  { %1184 = vst.msk [vmem:[%s4299_s3 + $0x180] sm:$0xff] %vm1134_vm0, %v958_v59  ;;  %v962_v15 = vadd.f32 %v738_v6, %v66_v2  ;;  %v525_v59 = vld [vmem:[%s4297_s1 + $0x1f8] sm:$0x3f] }
 0x189   :  { %v749_v61 = vadd.f32 %v525_v59, %v301_v58  ;;  %v314_v59 = vld [vmem:[%s4296_s0 + $0x260] sm:$0xff] }
 0x18f   :  { %v67_v7 = vld [vmem:[%s4298_s2 + $0x1a8] sm:$0x3f] }
 0x190   :  { %1185 = vst.msk [vmem:[%s4299_s3 + $0x188] sm:$0x3f] %vm1136_vm1, %v959_v0  ;;  %v963_v20 = vadd.f32 %v739_v11, %v67_v7  ;;  %v526_v0 = vld [vmem:[%s4297_s1 + $0x200] sm:$0xff] }
 0x191   :  { %v750_v2 = vadd.f32 %v526_v0, %v302_v63  ;;  %v315_v0 = vld [vmem:[%s4296_s0 + $0x268] sm:$0x3f] }
 0x197   :  { %v68_v12 = vld [vmem:[%s4298_s2 + $0x1b0] sm:$0xff] }
 0x198   :  { %1186 = vst.msk [vmem:[%s4299_s3 + $0x190] sm:$0xff] %vm1134_vm0, %v960_v5  ;;  %v964_v25 = vadd.f32 %v740_v16, %v68_v12  ;;  %v527_v5 = vld [vmem:[%s4297_s1 + $0x208] sm:$0x3f] }
 0x199   :  { %v751_v7 = vadd.f32 %v527_v5, %v303_v4  ;;  %v316_v5 = vld [vmem:[%s4296_s0 + $0x270] sm:$0xff] }
 0x19f   :  { %v69_v17 = vld [vmem:[%s4298_s2 + $0x1b8] sm:$0x3f] }
 0x1a0   :  { %1187 = vst.msk [vmem:[%s4299_s3 + $0x198] sm:$0x3f] %vm1136_vm1, %v961_v10  ;;  %v965_v30 = vadd.f32 %v741_v21, %v69_v17  ;;  %v528_v10 = vld [vmem:[%s4297_s1 + $0x210] sm:$0xff] }
 0x1a1   :  { %v752_v12 = vadd.f32 %v528_v10, %v304_v9  ;;  %v317_v10 = vld [vmem:[%s4296_s0 + $0x278] sm:$0x3f] }
 0x1a7   :  { %v70_v22 = vld [vmem:[%s4298_s2 + $0x1c0] sm:$0xff] }
 0x1a8   :  { %1188 = vst.msk [vmem:[%s4299_s3 + $0x1a0] sm:$0xff] %vm1134_vm0, %v962_v15  ;;  %v966_v35 = vadd.f32 %v742_v26, %v70_v22  ;;  %v529_v15 = vld [vmem:[%s4297_s1 + $0x218] sm:$0x3f] }
 0x1a9   :  { %v753_v17 = vadd.f32 %v529_v15, %v305_v14  ;;  %v318_v15 = vld [vmem:[%s4296_s0 + $0x280] sm:$0xff] }
 0x1af   :  { %v71_v27 = vld [vmem:[%s4298_s2 + $0x1c8] sm:$0x3f] }
 0x1b0   :  { %1189 = vst.msk [vmem:[%s4299_s3 + $0x1a8] sm:$0x3f] %vm1136_vm1, %v963_v20  ;;  %v967_v40 = vadd.f32 %v743_v31, %v71_v27  ;;  %v530_v20 = vld [vmem:[%s4297_s1 + $0x220] sm:$0xff] }
 0x1b1   :  { %v754_v22 = vadd.f32 %v530_v20, %v306_v19  ;;  %v319_v20 = vld [vmem:[%s4296_s0 + $0x288] sm:$0x3f] }
 0x1b7   :  { %v72_v32 = vld [vmem:[%s4298_s2 + $0x1d0] sm:$0xff] }
 0x1b8   :  { %1190 = vst.msk [vmem:[%s4299_s3 + $0x1b0] sm:$0xff] %vm1134_vm0, %v964_v25  ;;  %v968_v45 = vadd.f32 %v744_v36, %v72_v32  ;;  %v531_v25 = vld [vmem:[%s4297_s1 + $0x228] sm:$0x3f] }
 0x1b9   :  { %v755_v27 = vadd.f32 %v531_v25, %v307_v24  ;;  %v320_v25 = vld [vmem:[%s4296_s0 + $0x290] sm:$0xff] }
 0x1bf   :  { %v73_v37 = vld [vmem:[%s4298_s2 + $0x1d8] sm:$0x3f] }
 0x1c0   :  { %1191 = vst.msk [vmem:[%s4299_s3 + $0x1b8] sm:$0x3f] %vm1136_vm1, %v965_v30  ;;  %v969_v50 = vadd.f32 %v745_v41, %v73_v37  ;;  %v532_v30 = vld [vmem:[%s4297_s1 + $0x230] sm:$0xff] }
 0x1c1   :  { %v756_v32 = vadd.f32 %v532_v30, %v308_v29  ;;  %v321_v30 = vld [vmem:[%s4296_s0 + $0x298] sm:$0x3f] }
 0x1c7   :  { %v74_v42 = vld [vmem:[%s4298_s2 + $0x1e0] sm:$0xff] }
 0x1c8   :  { %1192 = vst.msk [vmem:[%s4299_s3 + $0x1c0] sm:$0xff] %vm1134_vm0, %v966_v35  ;;  %v970_v55 = vadd.f32 %v746_v46, %v74_v42  ;;  %v533_v35 = vld [vmem:[%s4297_s1 + $0x238] sm:$0x3f] }
 0x1c9   :  { %v757_v37 = vadd.f32 %v533_v35, %v309_v34  ;;  %v322_v35 = vld [vmem:[%s4296_s0 + $0x2a0] sm:$0xff] }
 0x1cf   :  { %v75_v47 = vld [vmem:[%s4298_s2 + $0x1e8] sm:$0x3f] }
 0x1d0   :  { %1193 = vst.msk [vmem:[%s4299_s3 + $0x1c8] sm:$0x3f] %vm1136_vm1, %v967_v40  ;;  %v971_v60 = vadd.f32 %v747_v51, %v75_v47  ;;  %v534_v40 = vld [vmem:[%s4297_s1 + $0x240] sm:$0xff] }
 0x1d1   :  { %v758_v42 = vadd.f32 %v534_v40, %v310_v39  ;;  %v323_v40 = vld [vmem:[%s4296_s0 + $0x2a8] sm:$0x3f] }
 0x1d7   :  { %v76_v52 = vld [vmem:[%s4298_s2 + $0x1f0] sm:$0xff] }
 0x1d8   :  { %1194 = vst.msk [vmem:[%s4299_s3 + $0x1d0] sm:$0xff] %vm1134_vm0, %v968_v45  ;;  %v972_v1 = vadd.f32 %v748_v56, %v76_v52  ;;  %v535_v45 = vld [vmem:[%s4297_s1 + $0x248] sm:$0x3f] }
 0x1d9   :  { %v759_v47 = vadd.f32 %v535_v45, %v311_v44  ;;  %v324_v45 = vld [vmem:[%s4296_s0 + $0x2b0] sm:$0xff] }
 0x1df   :  { %v77_v57 = vld [vmem:[%s4298_s2 + $0x1f8] sm:$0x3f] }
 0x1e0   :  { %1195 = vst.msk [vmem:[%s4299_s3 + $0x1d8] sm:$0x3f] %vm1136_vm1, %v969_v50  ;;  %v973_v6 = vadd.f32 %v749_v61, %v77_v57  ;;  %v536_v50 = vld [vmem:[%s4297_s1 + $0x250] sm:$0xff] }
 0x1e1   :  { %v760_v52 = vadd.f32 %v536_v50, %v312_v49  ;;  %v325_v50 = vld [vmem:[%s4296_s0 + $0x2b8] sm:$0x3f] }
 0x1e7   :  { %v78_v62 = vld [vmem:[%s4298_s2 + $0x200] sm:$0xff] }
 0x1e8   :  { %1196 = vst.msk [vmem:[%s4299_s3 + $0x1e0] sm:$0xff] %vm1134_vm0, %v970_v55  ;;  %v974_v11 = vadd.f32 %v750_v2, %v78_v62  ;;  %v537_v55 = vld [vmem:[%s4297_s1 + $0x258] sm:$0x3f] }
 0x1e9   :  { %v761_v57 = vadd.f32 %v537_v55, %v313_v54  ;;  %v326_v55 = vld [vmem:[%s4296_s0 + $0x2c0] sm:$0xff] }
 0x1ef   :  { %v79_v3 = vld [vmem:[%s4298_s2 + $0x208] sm:$0x3f] }
 0x1f0   :  { %1197 = vst.msk [vmem:[%s4299_s3 + $0x1e8] sm:$0x3f] %vm1136_vm1, %v971_v60  ;;  %v975_v16 = vadd.f32 %v751_v7, %v79_v3  ;;  %v538_v60 = vld [vmem:[%s4297_s1 + $0x260] sm:$0xff] }
 0x1f1   :  { %v762_v62 = vadd.f32 %v538_v60, %v314_v59  ;;  %v327_v60 = vld [vmem:[%s4296_s0 + $0x2c8] sm:$0x3f] }
 0x1f7   :  { %v80_v8 = vld [vmem:[%s4298_s2 + $0x210] sm:$0xff] }
 0x1f8   :  { %1198 = vst.msk [vmem:[%s4299_s3 + $0x1f0] sm:$0xff] %vm1134_vm0, %v972_v1  ;;  %v976_v21 = vadd.f32 %v752_v12, %v80_v8  ;;  %v539_v1 = vld [vmem:[%s4297_s1 + $0x268] sm:$0x3f] }
 0x1f9   :  { %v763_v3 = vadd.f32 %v539_v1, %v315_v0  ;;  %v328_v1 = vld [vmem:[%s4296_s0 + $0x2d0] sm:$0xff] }
 0x1ff   :  { %v81_v13 = vld [vmem:[%s4298_s2 + $0x218] sm:$0x3f] }
 0x200   :  { %1199 = vst.msk [vmem:[%s4299_s3 + $0x1f8] sm:$0x3f] %vm1136_vm1, %v973_v6  ;;  %v977_v26 = vadd.f32 %v753_v17, %v81_v13  ;;  %v540_v6 = vld [vmem:[%s4297_s1 + $0x270] sm:$0xff] }
 0x201   :  { %v764_v8 = vadd.f32 %v540_v6, %v316_v5  ;;  %v329_v6 = vld [vmem:[%s4296_s0 + $0x2d8] sm:$0x3f] }
 0x207   :  { %v82_v18 = vld [vmem:[%s4298_s2 + $0x220] sm:$0xff] }
 0x208   :  { %1200 = vst.msk [vmem:[%s4299_s3 + $0x200] sm:$0xff] %vm1134_vm0, %v974_v11  ;;  %v978_v31 = vadd.f32 %v754_v22, %v82_v18  ;;  %v541_v11 = vld [vmem:[%s4297_s1 + $0x278] sm:$0x3f] }
 0x209   :  { %v765_v13 = vadd.f32 %v541_v11, %v317_v10  ;;  %v330_v11 = vld [vmem:[%s4296_s0 + $0x2e0] sm:$0xff] }
 0x20f   :  { %v83_v23 = vld [vmem:[%s4298_s2 + $0x228] sm:$0x3f] }
 0x210   :  { %1201 = vst.msk [vmem:[%s4299_s3 + $0x208] sm:$0x3f] %vm1136_vm1, %v975_v16  ;;  %v979_v36 = vadd.f32 %v755_v27, %v83_v23  ;;  %v542_v16 = vld [vmem:[%s4297_s1 + $0x280] sm:$0xff] }
 0x211   :  { %v766_v18 = vadd.f32 %v542_v16, %v318_v15  ;;  %v331_v16 = vld [vmem:[%s4296_s0 + $0x2e8] sm:$0x3f] }
 0x217   :  { %v84_v28 = vld [vmem:[%s4298_s2 + $0x230] sm:$0xff] }
 0x218   :  { %1202 = vst.msk [vmem:[%s4299_s3 + $0x210] sm:$0xff] %vm1134_vm0, %v976_v21  ;;  %v980_v41 = vadd.f32 %v756_v32, %v84_v28  ;;  %v543_v21 = vld [vmem:[%s4297_s1 + $0x288] sm:$0x3f] }
 0x219   :  { %v767_v23 = vadd.f32 %v543_v21, %v319_v20  ;;  %v332_v21 = vld [vmem:[%s4296_s0 + $0x2f0] sm:$0xff] }
 0x21f   :  { %v85_v33 = vld [vmem:[%s4298_s2 + $0x238] sm:$0x3f] }
 0x220   :  { %1203 = vst.msk [vmem:[%s4299_s3 + $0x218] sm:$0x3f] %vm1136_vm1, %v977_v26  ;;  %v981_v46 = vadd.f32 %v757_v37, %v85_v33  ;;  %v544_v26 = vld [vmem:[%s4297_s1 + $0x290] sm:$0xff] }
 0x221   :  { %v768_v28 = vadd.f32 %v544_v26, %v320_v25  ;;  %v333_v26 = vld [vmem:[%s4296_s0 + $0x2f8] sm:$0x3f] }
 0x227   :  { %v86_v38 = vld [vmem:[%s4298_s2 + $0x240] sm:$0xff] }
 0x228   :  { %1204 = vst.msk [vmem:[%s4299_s3 + $0x220] sm:$0xff] %vm1134_vm0, %v978_v31  ;;  %v982_v51 = vadd.f32 %v758_v42, %v86_v38  ;;  %v545_v31 = vld [vmem:[%s4297_s1 + $0x298] sm:$0x3f] }
 0x229   :  { %v769_v33 = vadd.f32 %v545_v31, %v321_v30  ;;  %v334_v31 = vld [vmem:[%s4296_s0 + $0x300] sm:$0xff] }
 0x22f   :  { %v87_v43 = vld [vmem:[%s4298_s2 + $0x248] sm:$0x3f] }
 0x230   :  { %1205 = vst.msk [vmem:[%s4299_s3 + $0x228] sm:$0x3f] %vm1136_vm1, %v979_v36  ;;  %v983_v56 = vadd.f32 %v759_v47, %v87_v43  ;;  %v546_v36 = vld [vmem:[%s4297_s1 + $0x2a0] sm:$0xff] }
 0x231   :  { %v770_v38 = vadd.f32 %v546_v36, %v322_v35  ;;  %v335_v36 = vld [vmem:[%s4296_s0 + $0x308] sm:$0x3f] }
 0x237   :  { %v88_v48 = vld [vmem:[%s4298_s2 + $0x250] sm:$0xff] }
 0x238   :  { %1206 = vst.msk [vmem:[%s4299_s3 + $0x230] sm:$0xff] %vm1134_vm0, %v980_v41  ;;  %v984_v61 = vadd.f32 %v760_v52, %v88_v48  ;;  %v547_v41 = vld [vmem:[%s4297_s1 + $0x2a8] sm:$0x3f] }
 0x239   :  { %v771_v43 = vadd.f32 %v547_v41, %v323_v40  ;;  %v336_v41 = vld [vmem:[%s4296_s0 + $0x310] sm:$0xff] }
 0x23f   :  { %v89_v53 = vld [vmem:[%s4298_s2 + $0x258] sm:$0x3f] }
 0x240   :  { %1207 = vst.msk [vmem:[%s4299_s3 + $0x238] sm:$0x3f] %vm1136_vm1, %v981_v46  ;;  %v985_v2 = vadd.f32 %v761_v57, %v89_v53  ;;  %v548_v46 = vld [vmem:[%s4297_s1 + $0x2b0] sm:$0xff] }
 0x241   :  { %v772_v48 = vadd.f32 %v548_v46, %v324_v45  ;;  %v337_v46 = vld [vmem:[%s4296_s0 + $0x318] sm:$0x3f] }
 0x247   :  { %v90_v58 = vld [vmem:[%s4298_s2 + $0x260] sm:$0xff] }
 0x248   :  { %1208 = vst.msk [vmem:[%s4299_s3 + $0x240] sm:$0xff] %vm1134_vm0, %v982_v51  ;;  %v986_v7 = vadd.f32 %v762_v62, %v90_v58  ;;  %v549_v51 = vld [vmem:[%s4297_s1 + $0x2b8] sm:$0x3f] }
 0x249   :  { %v773_v53 = vadd.f32 %v549_v51, %v325_v50  ;;  %v338_v51 = vld [vmem:[%s4296_s0 + $0x320] sm:$0xff] }
 0x24f   :  { %v91_v63 = vld [vmem:[%s4298_s2 + $0x268] sm:$0x3f] }
 0x250   :  { %1209 = vst.msk [vmem:[%s4299_s3 + $0x248] sm:$0x3f] %vm1136_vm1, %v983_v56  ;;  %v987_v12 = vadd.f32 %v763_v3, %v91_v63  ;;  %v550_v56 = vld [vmem:[%s4297_s1 + $0x2c0] sm:$0xff] }
 0x251   :  { %v774_v58 = vadd.f32 %v550_v56, %v326_v55  ;;  %v339_v56 = vld [vmem:[%s4296_s0 + $0x328] sm:$0x3f] }
 0x257   :  { %v92_v4 = vld [vmem:[%s4298_s2 + $0x270] sm:$0xff] }
 0x258   :  { %1210 = vst.msk [vmem:[%s4299_s3 + $0x250] sm:$0xff] %vm1134_vm0, %v984_v61  ;;  %v988_v17 = vadd.f32 %v764_v8, %v92_v4  ;;  %v551_v61 = vld [vmem:[%s4297_s1 + $0x2c8] sm:$0x3f] }
 0x259   :  { %v775_v63 = vadd.f32 %v551_v61, %v327_v60  ;;  %v340_v61 = vld [vmem:[%s4296_s0 + $0x330] sm:$0xff] }
 0x25f   :  { %v93_v9 = vld [vmem:[%s4298_s2 + $0x278] sm:$0x3f] }
 0x260   :  { %1211 = vst.msk [vmem:[%s4299_s3 + $0x258] sm:$0x3f] %vm1136_vm1, %v985_v2  ;;  %v989_v22 = vadd.f32 %v765_v13, %v93_v9  ;;  %v552_v2 = vld [vmem:[%s4297_s1 + $0x2d0] sm:$0xff] }
 0x261   :  { %v776_v4 = vadd.f32 %v552_v2, %v328_v1  ;;  %v341_v2 = vld [vmem:[%s4296_s0 + $0x338] sm:$0x3f] }
 0x267   :  { %v94_v14 = vld [vmem:[%s4298_s2 + $0x280] sm:$0xff] }
 0x268   :  { %1212 = vst.msk [vmem:[%s4299_s3 + $0x260] sm:$0xff] %vm1134_vm0, %v986_v7  ;;  %v990_v27 = vadd.f32 %v766_v18, %v94_v14  ;;  %v553_v7 = vld [vmem:[%s4297_s1 + $0x2d8] sm:$0x3f] }
 0x269   :  { %v777_v9 = vadd.f32 %v553_v7, %v329_v6  ;;  %v342_v7 = vld [vmem:[%s4296_s0 + $0x340] sm:$0xff] }
 0x26f   :  { %v95_v19 = vld [vmem:[%s4298_s2 + $0x288] sm:$0x3f] }
 0x270   :  { %1213 = vst.msk [vmem:[%s4299_s3 + $0x268] sm:$0x3f] %vm1136_vm1, %v987_v12  ;;  %v991_v32 = vadd.f32 %v767_v23, %v95_v19  ;;  %v554_v12 = vld [vmem:[%s4297_s1 + $0x2e0] sm:$0xff] }
 0x271   :  { %v778_v14 = vadd.f32 %v554_v12, %v330_v11  ;;  %v343_v12 = vld [vmem:[%s4296_s0 + $0x348] sm:$0x3f] }
 0x277   :  { %v96_v24 = vld [vmem:[%s4298_s2 + $0x290] sm:$0xff] }
 0x278   :  { %1214 = vst.msk [vmem:[%s4299_s3 + $0x270] sm:$0xff] %vm1134_vm0, %v988_v17  ;;  %v992_v37 = vadd.f32 %v768_v28, %v96_v24  ;;  %v555_v17 = vld [vmem:[%s4297_s1 + $0x2e8] sm:$0x3f] }
 0x279   :  { %v779_v19 = vadd.f32 %v555_v17, %v331_v16  ;;  %v344_v17 = vld [vmem:[%s4296_s0 + $0x350] sm:$0xff] }
 0x27f   :  { %v97_v29 = vld [vmem:[%s4298_s2 + $0x298] sm:$0x3f] }
 0x280   :  { %1215 = vst.msk [vmem:[%s4299_s3 + $0x278] sm:$0x3f] %vm1136_vm1, %v989_v22  ;;  %v993_v42 = vadd.f32 %v769_v33, %v97_v29  ;;  %v556_v22 = vld [vmem:[%s4297_s1 + $0x2f0] sm:$0xff] }
 0x281   :  { %v780_v24 = vadd.f32 %v556_v22, %v332_v21  ;;  %v345_v22 = vld [vmem:[%s4296_s0 + $0x358] sm:$0x3f] }
 0x287   :  { %v98_v34 = vld [vmem:[%s4298_s2 + $0x2a0] sm:$0xff] }
 0x288   :  { %1216 = vst.msk [vmem:[%s4299_s3 + $0x280] sm:$0xff] %vm1134_vm0, %v990_v27  ;;  %v994_v47 = vadd.f32 %v770_v38, %v98_v34  ;;  %v557_v27 = vld [vmem:[%s4297_s1 + $0x2f8] sm:$0x3f] }
 0x289   :  { %v781_v29 = vadd.f32 %v557_v27, %v333_v26  ;;  %v346_v27 = vld [vmem:[%s4296_s0 + $0x360] sm:$0xff] }
 0x28f   :  { %v99_v39 = vld [vmem:[%s4298_s2 + $0x2a8] sm:$0x3f] }
 0x290   :  { %1217 = vst.msk [vmem:[%s4299_s3 + $0x288] sm:$0x3f] %vm1136_vm1, %v991_v32  ;;  %v995_v52 = vadd.f32 %v771_v43, %v99_v39  ;;  %v558_v32 = vld [vmem:[%s4297_s1 + $0x300] sm:$0xff] }
 0x291   :  { %v782_v34 = vadd.f32 %v558_v32, %v334_v31  ;;  %v347_v32 = vld [vmem:[%s4296_s0 + $0x368] sm:$0x3f] }
 0x297   :  { %v100_v44 = vld [vmem:[%s4298_s2 + $0x2b0] sm:$0xff] }
 0x298   :  { %1218 = vst.msk [vmem:[%s4299_s3 + $0x290] sm:$0xff] %vm1134_vm0, %v992_v37  ;;  %v996_v57 = vadd.f32 %v772_v48, %v100_v44  ;;  %v559_v37 = vld [vmem:[%s4297_s1 + $0x308] sm:$0x3f] }
 0x299   :  { %v783_v39 = vadd.f32 %v559_v37, %v335_v36  ;;  %v348_v37 = vld [vmem:[%s4296_s0 + $0x370] sm:$0xff] }
 0x29f   :  { %v101_v49 = vld [vmem:[%s4298_s2 + $0x2b8] sm:$0x3f] }
 0x2a0   :  { %1219 = vst.msk [vmem:[%s4299_s3 + $0x298] sm:$0x3f] %vm1136_vm1, %v993_v42  ;;  %v997_v62 = vadd.f32 %v773_v53, %v101_v49  ;;  %v560_v42 = vld [vmem:[%s4297_s1 + $0x310] sm:$0xff] }
 0x2a1   :  { %v784_v44 = vadd.f32 %v560_v42, %v336_v41  ;;  %v349_v42 = vld [vmem:[%s4296_s0 + $0x378] sm:$0x3f] }
 0x2a7   :  { %v102_v54 = vld [vmem:[%s4298_s2 + $0x2c0] sm:$0xff] }
 0x2a8   :  { %1220 = vst.msk [vmem:[%s4299_s3 + $0x2a0] sm:$0xff] %vm1134_vm0, %v994_v47  ;;  %v998_v3 = vadd.f32 %v774_v58, %v102_v54  ;;  %v561_v47 = vld [vmem:[%s4297_s1 + $0x318] sm:$0x3f] }
 0x2a9   :  { %v785_v49 = vadd.f32 %v561_v47, %v337_v46  ;;  %v350_v47 = vld [vmem:[%s4296_s0 + $0x380] sm:$0xff] }
 0x2af   :  { %v103_v59 = vld [vmem:[%s4298_s2 + $0x2c8] sm:$0x3f] }
 0x2b0   :  { %1221 = vst.msk [vmem:[%s4299_s3 + $0x2a8] sm:$0x3f] %vm1136_vm1, %v995_v52  ;;  %v999_v8 = vadd.f32 %v775_v63, %v103_v59  ;;  %v562_v52 = vld [vmem:[%s4297_s1 + $0x320] sm:$0xff] }
 0x2b1   :  { %v786_v54 = vadd.f32 %v562_v52, %v338_v51  ;;  %v351_v52 = vld [vmem:[%s4296_s0 + $0x388] sm:$0x3f] }
 0x2b7   :  { %v104_v0 = vld [vmem:[%s4298_s2 + $0x2d0] sm:$0xff] }
 0x2b8   :  { %1222 = vst.msk [vmem:[%s4299_s3 + $0x2b0] sm:$0xff] %vm1134_vm0, %v996_v57  ;;  %v1000_v13 = vadd.f32 %v776_v4, %v104_v0  ;;  %v563_v57 = vld [vmem:[%s4297_s1 + $0x328] sm:$0x3f] }
 0x2b9   :  { %v787_v59 = vadd.f32 %v563_v57, %v339_v56  ;;  %v352_v57 = vld [vmem:[%s4296_s0 + $0x390] sm:$0xff] }
 0x2bf   :  { %v105_v5 = vld [vmem:[%s4298_s2 + $0x2d8] sm:$0x3f] }
 0x2c0   :  { %1223 = vst.msk [vmem:[%s4299_s3 + $0x2b8] sm:$0x3f] %vm1136_vm1, %v997_v62  ;;  %v1001_v18 = vadd.f32 %v777_v9, %v105_v5  ;;  %v564_v62 = vld [vmem:[%s4297_s1 + $0x330] sm:$0xff] }
 0x2c1   :  { %v788_v0 = vadd.f32 %v564_v62, %v340_v61  ;;  %v353_v62 = vld [vmem:[%s4296_s0 + $0x398] sm:$0x3f] }
 0x2c7   :  { %v106_v10 = vld [vmem:[%s4298_s2 + $0x2e0] sm:$0xff] }
 0x2c8   :  { %1224 = vst.msk [vmem:[%s4299_s3 + $0x2c0] sm:$0xff] %vm1134_vm0, %v998_v3  ;;  %v1002_v23 = vadd.f32 %v778_v14, %v106_v10  ;;  %v565_v3 = vld [vmem:[%s4297_s1 + $0x338] sm:$0x3f] }
 0x2c9   :  { %v789_v5 = vadd.f32 %v565_v3, %v341_v2  ;;  %v354_v3 = vld [vmem:[%s4296_s0 + $0x3a0] sm:$0xff] }
 0x2cf   :  { %v107_v15 = vld [vmem:[%s4298_s2 + $0x2e8] sm:$0x3f] }
 0x2d0   :  { %1225 = vst.msk [vmem:[%s4299_s3 + $0x2c8] sm:$0x3f] %vm1136_vm1, %v999_v8  ;;  %v1003_v28 = vadd.f32 %v779_v19, %v107_v15  ;;  %v566_v8 = vld [vmem:[%s4297_s1 + $0x340] sm:$0xff] }
 0x2d1   :  { %v790_v10 = vadd.f32 %v566_v8, %v342_v7  ;;  %v355_v8 = vld [vmem:[%s4296_s0 + $0x3a8] sm:$0x3f] }
 0x2d7   :  { %v108_v20 = vld [vmem:[%s4298_s2 + $0x2f0] sm:$0xff] }
 0x2d8   :  { %1226 = vst.msk [vmem:[%s4299_s3 + $0x2d0] sm:$0xff] %vm1134_vm0, %v1000_v13  ;;  %v1004_v33 = vadd.f32 %v780_v24, %v108_v20  ;;  %v567_v13 = vld [vmem:[%s4297_s1 + $0x348] sm:$0x3f] }
 0x2d9   :  { %v791_v15 = vadd.f32 %v567_v13, %v343_v12  ;;  %v356_v13 = vld [vmem:[%s4296_s0 + $0x3b0] sm:$0xff] }
 0x2df   :  { %v109_v25 = vld [vmem:[%s4298_s2 + $0x2f8] sm:$0x3f] }
 0x2e0   :  { %1227 = vst.msk [vmem:[%s4299_s3 + $0x2d8] sm:$0x3f] %vm1136_vm1, %v1001_v18  ;;  %v1005_v38 = vadd.f32 %v781_v29, %v109_v25  ;;  %v568_v18 = vld [vmem:[%s4297_s1 + $0x350] sm:$0xff] }
 0x2e1   :  { %v792_v20 = vadd.f32 %v568_v18, %v344_v17  ;;  %v357_v18 = vld [vmem:[%s4296_s0 + $0x3b8] sm:$0x3f] }
 0x2e7   :  { %v110_v30 = vld [vmem:[%s4298_s2 + $0x300] sm:$0xff] }
 0x2e8   :  { %1228 = vst.msk [vmem:[%s4299_s3 + $0x2e0] sm:$0xff] %vm1134_vm0, %v1002_v23  ;;  %v1006_v43 = vadd.f32 %v782_v34, %v110_v30  ;;  %v569_v23 = vld [vmem:[%s4297_s1 + $0x358] sm:$0x3f] }
 0x2e9   :  { %v793_v25 = vadd.f32 %v569_v23, %v345_v22  ;;  %v358_v23 = vld [vmem:[%s4296_s0 + $0x3c0] sm:$0xff] }
 0x2ef   :  { %v111_v35 = vld [vmem:[%s4298_s2 + $0x308] sm:$0x3f] }
 0x2f0   :  { %1229 = vst.msk [vmem:[%s4299_s3 + $0x2e8] sm:$0x3f] %vm1136_vm1, %v1003_v28  ;;  %v1007_v48 = vadd.f32 %v783_v39, %v111_v35  ;;  %v570_v28 = vld [vmem:[%s4297_s1 + $0x360] sm:$0xff] }
 0x2f1   :  { %v794_v30 = vadd.f32 %v570_v28, %v346_v27  ;;  %v359_v28 = vld [vmem:[%s4296_s0 + $0x3c8] sm:$0x3f] }
 0x2f7   :  { %v112_v40 = vld [vmem:[%s4298_s2 + $0x310] sm:$0xff] }
 0x2f8   :  { %1230 = vst.msk [vmem:[%s4299_s3 + $0x2f0] sm:$0xff] %vm1134_vm0, %v1004_v33  ;;  %v1008_v53 = vadd.f32 %v784_v44, %v112_v40  ;;  %v571_v33 = vld [vmem:[%s4297_s1 + $0x368] sm:$0x3f] }
 0x2f9   :  { %v795_v35 = vadd.f32 %v571_v33, %v347_v32  ;;  %v360_v33 = vld [vmem:[%s4296_s0 + $0x3d0] sm:$0xff] }
 0x2ff   :  { %v113_v45 = vld [vmem:[%s4298_s2 + $0x318] sm:$0x3f] }
 0x300   :  { %1231 = vst.msk [vmem:[%s4299_s3 + $0x2f8] sm:$0x3f] %vm1136_vm1, %v1005_v38  ;;  %v1009_v58 = vadd.f32 %v785_v49, %v113_v45  ;;  %v572_v38 = vld [vmem:[%s4297_s1 + $0x370] sm:$0xff] }
 0x301   :  { %v796_v40 = vadd.f32 %v572_v38, %v348_v37  ;;  %v361_v38 = vld [vmem:[%s4296_s0 + $0x3d8] sm:$0x3f] }
 0x307   :  { %v114_v50 = vld [vmem:[%s4298_s2 + $0x320] sm:$0xff] }
 0x308   :  { %1232 = vst.msk [vmem:[%s4299_s3 + $0x300] sm:$0xff] %vm1134_vm0, %v1006_v43  ;;  %v1010_v63 = vadd.f32 %v786_v54, %v114_v50  ;;  %v573_v43 = vld [vmem:[%s4297_s1 + $0x378] sm:$0x3f] }
 0x309   :  { %v797_v45 = vadd.f32 %v573_v43, %v349_v42  ;;  %v362_v43 = vld [vmem:[%s4296_s0 + $0x3e0] sm:$0xff] }
 0x30f   :  { %v115_v55 = vld [vmem:[%s4298_s2 + $0x328] sm:$0x3f] }
 0x310   :  { %1233 = vst.msk [vmem:[%s4299_s3 + $0x308] sm:$0x3f] %vm1136_vm1, %v1007_v48  ;;  %v1011_v4 = vadd.f32 %v787_v59, %v115_v55  ;;  %v574_v48 = vld [vmem:[%s4297_s1 + $0x380] sm:$0xff] }
 0x311   :  { %v798_v50 = vadd.f32 %v574_v48, %v350_v47  ;;  %v363_v48 = vld [vmem:[%s4296_s0 + $0x3e8] sm:$0x3f] }
 0x317   :  { %v116_v60 = vld [vmem:[%s4298_s2 + $0x330] sm:$0xff] }
 0x318   :  { %1234 = vst.msk [vmem:[%s4299_s3 + $0x310] sm:$0xff] %vm1134_vm0, %v1008_v53  ;;  %v1012_v9 = vadd.f32 %v788_v0, %v116_v60  ;;  %v575_v53 = vld [vmem:[%s4297_s1 + $0x388] sm:$0x3f] }
 0x319   :  { %v799_v55 = vadd.f32 %v575_v53, %v351_v52  ;;  %v364_v53 = vld [vmem:[%s4296_s0 + $0x3f0] sm:$0xff] }
 0x31f   :  { %v117_v1 = vld [vmem:[%s4298_s2 + $0x338] sm:$0x3f] }
 0x320   :  { %1235 = vst.msk [vmem:[%s4299_s3 + $0x318] sm:$0x3f] %vm1136_vm1, %v1009_v58  ;;  %v1013_v14 = vadd.f32 %v789_v5, %v117_v1  ;;  %v576_v58 = vld [vmem:[%s4297_s1 + $0x390] sm:$0xff] }
 0x321   :  { %v800_v60 = vadd.f32 %v576_v58, %v352_v57  ;;  %v365_v58 = vld [vmem:[%s4296_s0 + $0x3f8] sm:$0x3f] }
 0x327   :  { %v118_v6 = vld [vmem:[%s4298_s2 + $0x340] sm:$0xff] }
 0x328   :  { %1236 = vst.msk [vmem:[%s4299_s3 + $0x320] sm:$0xff] %vm1134_vm0, %v1010_v63  ;;  %v1014_v19 = vadd.f32 %v790_v10, %v118_v6  ;;  %v577_v63 = vld [vmem:[%s4297_s1 + $0x398] sm:$0x3f] }
 0x329   :  { %v801_v1 = vadd.f32 %v577_v63, %v353_v62  ;;  %v366_v63 = vld [vmem:[%s4296_s0 + $0x400] sm:$0xff] }
 0x32f   :  { %v119_v11 = vld [vmem:[%s4298_s2 + $0x348] sm:$0x3f] }
 0x330   :  { %1237 = vst.msk [vmem:[%s4299_s3 + $0x328] sm:$0x3f] %vm1136_vm1, %v1011_v4  ;;  %v1015_v24 = vadd.f32 %v791_v15, %v119_v11  ;;  %v578_v4 = vld [vmem:[%s4297_s1 + $0x3a0] sm:$0xff] }
 0x331   :  { %v802_v6 = vadd.f32 %v578_v4, %v354_v3  ;;  %v367_v4 = vld [vmem:[%s4296_s0 + $0x408] sm:$0x3f] }
 0x337   :  { %v120_v16 = vld [vmem:[%s4298_s2 + $0x350] sm:$0xff] }
 0x338   :  { %1238 = vst.msk [vmem:[%s4299_s3 + $0x330] sm:$0xff] %vm1134_vm0, %v1012_v9  ;;  %v1016_v29 = vadd.f32 %v792_v20, %v120_v16  ;;  %v579_v9 = vld [vmem:[%s4297_s1 + $0x3a8] sm:$0x3f] }
 0x339   :  { %v803_v11 = vadd.f32 %v579_v9, %v355_v8  ;;  %v368_v9 = vld [vmem:[%s4296_s0 + $0x410] sm:$0xff] }
 0x33f   :  { %v121_v21 = vld [vmem:[%s4298_s2 + $0x358] sm:$0x3f] }
 0x340   :  { %1239 = vst.msk [vmem:[%s4299_s3 + $0x338] sm:$0x3f] %vm1136_vm1, %v1013_v14  ;;  %v1017_v34 = vadd.f32 %v793_v25, %v121_v21  ;;  %v580_v14 = vld [vmem:[%s4297_s1 + $0x3b0] sm:$0xff] }
 0x341   :  { %v804_v16 = vadd.f32 %v580_v14, %v356_v13  ;;  %v369_v14 = vld [vmem:[%s4296_s0 + $0x418] sm:$0x3f] }
 0x347   :  { %v122_v26 = vld [vmem:[%s4298_s2 + $0x360] sm:$0xff] }
 0x348   :  { %1240 = vst.msk [vmem:[%s4299_s3 + $0x340] sm:$0xff] %vm1134_vm0, %v1014_v19  ;;  %v1018_v39 = vadd.f32 %v794_v30, %v122_v26  ;;  %v581_v19 = vld [vmem:[%s4297_s1 + $0x3b8] sm:$0x3f] }
 0x349   :  { %v805_v21 = vadd.f32 %v581_v19, %v357_v18  ;;  %v370_v19 = vld [vmem:[%s4296_s0 + $0x420] sm:$0xff] }
 0x34f   :  { %v123_v31 = vld [vmem:[%s4298_s2 + $0x368] sm:$0x3f] }
 0x350   :  { %1241 = vst.msk [vmem:[%s4299_s3 + $0x348] sm:$0x3f] %vm1136_vm1, %v1015_v24  ;;  %v1019_v44 = vadd.f32 %v795_v35, %v123_v31  ;;  %v582_v24 = vld [vmem:[%s4297_s1 + $0x3c0] sm:$0xff] }
 0x351   :  { %v806_v26 = vadd.f32 %v582_v24, %v358_v23  ;;  %v371_v24 = vld [vmem:[%s4296_s0 + $0x428] sm:$0x3f] }
 0x357   :  { %v124_v36 = vld [vmem:[%s4298_s2 + $0x370] sm:$0xff] }
 0x358   :  { %1242 = vst.msk [vmem:[%s4299_s3 + $0x350] sm:$0xff] %vm1134_vm0, %v1016_v29  ;;  %v1020_v49 = vadd.f32 %v796_v40, %v124_v36  ;;  %v583_v29 = vld [vmem:[%s4297_s1 + $0x3c8] sm:$0x3f] }
 0x359   :  { %v807_v31 = vadd.f32 %v583_v29, %v359_v28  ;;  %v372_v29 = vld [vmem:[%s4296_s0 + $0x430] sm:$0xff] }
 0x35f   :  { %v125_v41 = vld [vmem:[%s4298_s2 + $0x378] sm:$0x3f] }
 0x360   :  { %1243 = vst.msk [vmem:[%s4299_s3 + $0x358] sm:$0x3f] %vm1136_vm1, %v1017_v34  ;;  %v1021_v54 = vadd.f32 %v797_v45, %v125_v41  ;;  %v584_v34 = vld [vmem:[%s4297_s1 + $0x3d0] sm:$0xff] }
 0x361   :  { %v808_v36 = vadd.f32 %v584_v34, %v360_v33  ;;  %v373_v34 = vld [vmem:[%s4296_s0 + $0x438] sm:$0x3f] }
 0x367   :  { %v126_v46 = vld [vmem:[%s4298_s2 + $0x380] sm:$0xff] }
 0x368   :  { %1244 = vst.msk [vmem:[%s4299_s3 + $0x360] sm:$0xff] %vm1134_vm0, %v1018_v39  ;;  %v1022_v59 = vadd.f32 %v798_v50, %v126_v46  ;;  %v585_v39 = vld [vmem:[%s4297_s1 + $0x3d8] sm:$0x3f] }
 0x369   :  { %v809_v41 = vadd.f32 %v585_v39, %v361_v38  ;;  %v374_v39 = vld [vmem:[%s4296_s0 + $0x440] sm:$0xff] }
 0x36f   :  { %v127_v51 = vld [vmem:[%s4298_s2 + $0x388] sm:$0x3f] }
 0x370   :  { %1245 = vst.msk [vmem:[%s4299_s3 + $0x368] sm:$0x3f] %vm1136_vm1, %v1019_v44  ;;  %v1023_v0 = vadd.f32 %v799_v55, %v127_v51  ;;  %v586_v44 = vld [vmem:[%s4297_s1 + $0x3e0] sm:$0xff] }
 0x371   :  { %v810_v46 = vadd.f32 %v586_v44, %v362_v43  ;;  %v375_v44 = vld [vmem:[%s4296_s0 + $0x448] sm:$0x3f] }
 0x377   :  { %v128_v56 = vld [vmem:[%s4298_s2 + $0x390] sm:$0xff] }
 0x378   :  { %1246 = vst.msk [vmem:[%s4299_s3 + $0x370] sm:$0xff] %vm1134_vm0, %v1020_v49  ;;  %v1024_v5 = vadd.f32 %v800_v60, %v128_v56  ;;  %v587_v49 = vld [vmem:[%s4297_s1 + $0x3e8] sm:$0x3f] }
 0x379   :  { %v811_v51 = vadd.f32 %v587_v49, %v363_v48  ;;  %v376_v49 = vld [vmem:[%s4296_s0 + $0x450] sm:$0xff] }
 0x37f   :  { %v129_v61 = vld [vmem:[%s4298_s2 + $0x398] sm:$0x3f] }
 0x380   :  { %1247 = vst.msk [vmem:[%s4299_s3 + $0x378] sm:$0x3f] %vm1136_vm1, %v1021_v54  ;;  %v1025_v10 = vadd.f32 %v801_v1, %v129_v61  ;;  %v588_v54 = vld [vmem:[%s4297_s1 + $0x3f0] sm:$0xff] }
 0x381   :  { %v812_v56 = vadd.f32 %v588_v54, %v364_v53  ;;  %v377_v54 = vld [vmem:[%s4296_s0 + $0x458] sm:$0x3f] }
 0x387   :  { %v130_v2 = vld [vmem:[%s4298_s2 + $0x3a0] sm:$0xff] }
 0x388   :  { %1248 = vst.msk [vmem:[%s4299_s3 + $0x380] sm:$0xff] %vm1134_vm0, %v1022_v59  ;;  %v1026_v15 = vadd.f32 %v802_v6, %v130_v2  ;;  %v589_v59 = vld [vmem:[%s4297_s1 + $0x3f8] sm:$0x3f] }
 0x389   :  { %v813_v61 = vadd.f32 %v589_v59, %v365_v58  ;;  %v378_v59 = vld [vmem:[%s4296_s0 + $0x460] sm:$0xff] }
 0x38f   :  { %v131_v7 = vld [vmem:[%s4298_s2 + $0x3a8] sm:$0x3f] }
 0x390   :  { %1249 = vst.msk [vmem:[%s4299_s3 + $0x388] sm:$0x3f] %vm1136_vm1, %v1023_v0  ;;  %v1027_v20 = vadd.f32 %v803_v11, %v131_v7  ;;  %v590_v0 = vld [vmem:[%s4297_s1 + $0x400] sm:$0xff] }
 0x391   :  { %v814_v2 = vadd.f32 %v590_v0, %v366_v63  ;;  %v379_v0 = vld [vmem:[%s4296_s0 + $0x468] sm:$0x3f] }
 0x397   :  { %v132_v12 = vld [vmem:[%s4298_s2 + $0x3b0] sm:$0xff] }
 0x398   :  { %1250 = vst.msk [vmem:[%s4299_s3 + $0x390] sm:$0xff] %vm1134_vm0, %v1024_v5  ;;  %v1028_v25 = vadd.f32 %v804_v16, %v132_v12  ;;  %v591_v5 = vld [vmem:[%s4297_s1 + $0x408] sm:$0x3f] }
 0x399   :  { %v815_v7 = vadd.f32 %v591_v5, %v367_v4  ;;  %v380_v5 = vld [vmem:[%s4296_s0 + $0x470] sm:$0xff] }
 0x39f   :  { %v133_v17 = vld [vmem:[%s4298_s2 + $0x3b8] sm:$0x3f] }
 0x3a0   :  { %1251 = vst.msk [vmem:[%s4299_s3 + $0x398] sm:$0x3f] %vm1136_vm1, %v1025_v10  ;;  %v1029_v30 = vadd.f32 %v805_v21, %v133_v17  ;;  %v592_v10 = vld [vmem:[%s4297_s1 + $0x410] sm:$0xff] }
 0x3a1   :  { %v816_v12 = vadd.f32 %v592_v10, %v368_v9  ;;  %v381_v10 = vld [vmem:[%s4296_s0 + $0x478] sm:$0x3f] }
 0x3a7   :  { %v134_v22 = vld [vmem:[%s4298_s2 + $0x3c0] sm:$0xff] }
 0x3a8   :  { %1252 = vst.msk [vmem:[%s4299_s3 + $0x3a0] sm:$0xff] %vm1134_vm0, %v1026_v15  ;;  %v1030_v35 = vadd.f32 %v806_v26, %v134_v22  ;;  %v593_v15 = vld [vmem:[%s4297_s1 + $0x418] sm:$0x3f] }
 0x3a9   :  { %v817_v17 = vadd.f32 %v593_v15, %v369_v14  ;;  %v382_v15 = vld [vmem:[%s4296_s0 + $0x480] sm:$0xff] }
 0x3af   :  { %v135_v27 = vld [vmem:[%s4298_s2 + $0x3c8] sm:$0x3f] }
 0x3b0   :  { %1253 = vst.msk [vmem:[%s4299_s3 + $0x3a8] sm:$0x3f] %vm1136_vm1, %v1027_v20  ;;  %v1031_v40 = vadd.f32 %v807_v31, %v135_v27  ;;  %v594_v20 = vld [vmem:[%s4297_s1 + $0x420] sm:$0xff] }
 0x3b1   :  { %v818_v22 = vadd.f32 %v594_v20, %v370_v19  ;;  %v383_v20 = vld [vmem:[%s4296_s0 + $0x488] sm:$0x3f] }
 0x3b7   :  { %v136_v32 = vld [vmem:[%s4298_s2 + $0x3d0] sm:$0xff] }
 0x3b8   :  { %1254 = vst.msk [vmem:[%s4299_s3 + $0x3b0] sm:$0xff] %vm1134_vm0, %v1028_v25  ;;  %v1032_v45 = vadd.f32 %v808_v36, %v136_v32  ;;  %v595_v25 = vld [vmem:[%s4297_s1 + $0x428] sm:$0x3f] }
 0x3b9   :  { %v819_v27 = vadd.f32 %v595_v25, %v371_v24  ;;  %v384_v25 = vld [vmem:[%s4296_s0 + $0x490] sm:$0xff] }
 0x3bf   :  { %v137_v37 = vld [vmem:[%s4298_s2 + $0x3d8] sm:$0x3f] }
 0x3c0   :  { %1255 = vst.msk [vmem:[%s4299_s3 + $0x3b8] sm:$0x3f] %vm1136_vm1, %v1029_v30  ;;  %v1033_v50 = vadd.f32 %v809_v41, %v137_v37  ;;  %v596_v30 = vld [vmem:[%s4297_s1 + $0x430] sm:$0xff] }
 0x3c1   :  { %v820_v32 = vadd.f32 %v596_v30, %v372_v29  ;;  %v385_v30 = vld [vmem:[%s4296_s0 + $0x498] sm:$0x3f] }
 0x3c7   :  { %v138_v42 = vld [vmem:[%s4298_s2 + $0x3e0] sm:$0xff] }
 0x3c8   :  { %1256 = vst.msk [vmem:[%s4299_s3 + $0x3c0] sm:$0xff] %vm1134_vm0, %v1030_v35  ;;  %v1034_v55 = vadd.f32 %v810_v46, %v138_v42  ;;  %v597_v35 = vld [vmem:[%s4297_s1 + $0x438] sm:$0x3f] }
 0x3c9   :  { %v821_v37 = vadd.f32 %v597_v35, %v373_v34  ;;  %v386_v35 = vld [vmem:[%s4296_s0 + $0x4a0] sm:$0xff] }
 0x3cf   :  { %v139_v47 = vld [vmem:[%s4298_s2 + $0x3e8] sm:$0x3f] }
 0x3d0   :  { %1257 = vst.msk [vmem:[%s4299_s3 + $0x3c8] sm:$0x3f] %vm1136_vm1, %v1031_v40  ;;  %v1035_v60 = vadd.f32 %v811_v51, %v139_v47  ;;  %v598_v40 = vld [vmem:[%s4297_s1 + $0x440] sm:$0xff] }
 0x3d1   :  { %v822_v42 = vadd.f32 %v598_v40, %v374_v39  ;;  %v387_v40 = vld [vmem:[%s4296_s0 + $0x4a8] sm:$0x3f] }
 0x3d7   :  { %v140_v52 = vld [vmem:[%s4298_s2 + $0x3f0] sm:$0xff] }
 0x3d8   :  { %1258 = vst.msk [vmem:[%s4299_s3 + $0x3d0] sm:$0xff] %vm1134_vm0, %v1032_v45  ;;  %v1036_v1 = vadd.f32 %v812_v56, %v140_v52  ;;  %v599_v45 = vld [vmem:[%s4297_s1 + $0x448] sm:$0x3f] }
 0x3d9   :  { %v823_v47 = vadd.f32 %v599_v45, %v375_v44  ;;  %v388_v45 = vld [vmem:[%s4296_s0 + $0x4b0] sm:$0xff] }
 0x3df   :  { %v141_v57 = vld [vmem:[%s4298_s2 + $0x3f8] sm:$0x3f] }
 0x3e0   :  { %1259 = vst.msk [vmem:[%s4299_s3 + $0x3d8] sm:$0x3f] %vm1136_vm1, %v1033_v50  ;;  %v1037_v6 = vadd.f32 %v813_v61, %v141_v57  ;;  %v600_v50 = vld [vmem:[%s4297_s1 + $0x450] sm:$0xff] }
 0x3e1   :  { %v824_v52 = vadd.f32 %v600_v50, %v376_v49  ;;  %v389_v50 = vld [vmem:[%s4296_s0 + $0x4b8] sm:$0x3f] }
 0x3e7   :  { %v142_v62 = vld [vmem:[%s4298_s2 + $0x400] sm:$0xff] }
 0x3e8   :  { %1260 = vst.msk [vmem:[%s4299_s3 + $0x3e0] sm:$0xff] %vm1134_vm0, %v1034_v55  ;;  %v1038_v11 = vadd.f32 %v814_v2, %v142_v62  ;;  %v601_v55 = vld [vmem:[%s4297_s1 + $0x458] sm:$0x3f] }
 0x3e9   :  { %v825_v57 = vadd.f32 %v601_v55, %v377_v54  ;;  %v390_v55 = vld [vmem:[%s4296_s0 + $0x4c0] sm:$0xff] }
 0x3ef   :  { %v143_v3 = vld [vmem:[%s4298_s2 + $0x408] sm:$0x3f] }
 0x3f0   :  { %1261 = vst.msk [vmem:[%s4299_s3 + $0x3e8] sm:$0x3f] %vm1136_vm1, %v1035_v60  ;;  %v1039_v16 = vadd.f32 %v815_v7, %v143_v3  ;;  %v602_v60 = vld [vmem:[%s4297_s1 + $0x460] sm:$0xff] }
 0x3f1   :  { %v826_v62 = vadd.f32 %v602_v60, %v378_v59  ;;  %v391_v60 = vld [vmem:[%s4296_s0 + $0x4c8] sm:$0x3f] }
 0x3f7   :  { %v144_v8 = vld [vmem:[%s4298_s2 + $0x410] sm:$0xff] }
 0x3f8   :  { %1262 = vst.msk [vmem:[%s4299_s3 + $0x3f0] sm:$0xff] %vm1134_vm0, %v1036_v1  ;;  %v1040_v21 = vadd.f32 %v816_v12, %v144_v8  ;;  %v603_v1 = vld [vmem:[%s4297_s1 + $0x468] sm:$0x3f] }
 0x3f9   :  { %v827_v3 = vadd.f32 %v603_v1, %v379_v0  ;;  %v392_v1 = vld [vmem:[%s4296_s0 + $0x4d0] sm:$0xff] }
 0x3ff   :  { %v145_v13 = vld [vmem:[%s4298_s2 + $0x418] sm:$0x3f] }
 0x400   :  { %1263 = vst.msk [vmem:[%s4299_s3 + $0x3f8] sm:$0x3f] %vm1136_vm1, %v1037_v6  ;;  %v1041_v26 = vadd.f32 %v817_v17, %v145_v13  ;;  %v604_v6 = vld [vmem:[%s4297_s1 + $0x470] sm:$0xff] }
 0x401   :  { %v828_v8 = vadd.f32 %v604_v6, %v380_v5  ;;  %v393_v6 = vld [vmem:[%s4296_s0 + $0x4d8] sm:$0x3f] }
 0x407   :  { %v146_v18 = vld [vmem:[%s4298_s2 + $0x420] sm:$0xff] }
 0x408   :  { %1264 = vst.msk [vmem:[%s4299_s3 + $0x400] sm:$0xff] %vm1134_vm0, %v1038_v11  ;;  %v1042_v31 = vadd.f32 %v818_v22, %v146_v18  ;;  %v605_v11 = vld [vmem:[%s4297_s1 + $0x478] sm:$0x3f] }
 0x409   :  { %v829_v13 = vadd.f32 %v605_v11, %v381_v10  ;;  %v394_v11 = vld [vmem:[%s4296_s0 + $0x4e0] sm:$0xff] }
 0x40f   :  { %v147_v23 = vld [vmem:[%s4298_s2 + $0x428] sm:$0x3f] }
 0x410   :  { %1265 = vst.msk [vmem:[%s4299_s3 + $0x408] sm:$0x3f] %vm1136_vm1, %v1039_v16  ;;  %v1043_v36 = vadd.f32 %v819_v27, %v147_v23  ;;  %v606_v16 = vld [vmem:[%s4297_s1 + $0x480] sm:$0xff] }
 0x411   :  { %v830_v18 = vadd.f32 %v606_v16, %v382_v15  ;;  %v395_v16 = vld [vmem:[%s4296_s0 + $0x4e8] sm:$0x3f] }
 0x417   :  { %v148_v28 = vld [vmem:[%s4298_s2 + $0x430] sm:$0xff] }
 0x418   :  { %1266 = vst.msk [vmem:[%s4299_s3 + $0x410] sm:$0xff] %vm1134_vm0, %v1040_v21  ;;  %v1044_v41 = vadd.f32 %v820_v32, %v148_v28  ;;  %v607_v21 = vld [vmem:[%s4297_s1 + $0x488] sm:$0x3f] }
 0x419   :  { %v831_v23 = vadd.f32 %v607_v21, %v383_v20  ;;  %v396_v21 = vld [vmem:[%s4296_s0 + $0x4f0] sm:$0xff] }
 0x41f   :  { %v149_v33 = vld [vmem:[%s4298_s2 + $0x438] sm:$0x3f] }
 0x420   :  { %1267 = vst.msk [vmem:[%s4299_s3 + $0x418] sm:$0x3f] %vm1136_vm1, %v1041_v26  ;;  %v1045_v46 = vadd.f32 %v821_v37, %v149_v33  ;;  %v608_v26 = vld [vmem:[%s4297_s1 + $0x490] sm:$0xff] }
 0x421   :  { %v832_v28 = vadd.f32 %v608_v26, %v384_v25  ;;  %v397_v26 = vld [vmem:[%s4296_s0 + $0x4f8] sm:$0x3f] }
 0x427   :  { %v150_v38 = vld [vmem:[%s4298_s2 + $0x440] sm:$0xff] }
 0x428   :  { %1268 = vst.msk [vmem:[%s4299_s3 + $0x420] sm:$0xff] %vm1134_vm0, %v1042_v31  ;;  %v1046_v51 = vadd.f32 %v822_v42, %v150_v38  ;;  %v609_v31 = vld [vmem:[%s4297_s1 + $0x498] sm:$0x3f] }
 0x429   :  { %v833_v33 = vadd.f32 %v609_v31, %v385_v30  ;;  %v398_v31 = vld [vmem:[%s4296_s0 + $0x500] sm:$0xff] }
 0x42f   :  { %v151_v43 = vld [vmem:[%s4298_s2 + $0x448] sm:$0x3f] }
 0x430   :  { %1269 = vst.msk [vmem:[%s4299_s3 + $0x428] sm:$0x3f] %vm1136_vm1, %v1043_v36  ;;  %v1047_v56 = vadd.f32 %v823_v47, %v151_v43  ;;  %v610_v36 = vld [vmem:[%s4297_s1 + $0x4a0] sm:$0xff] }
 0x431   :  { %v834_v38 = vadd.f32 %v610_v36, %v386_v35  ;;  %v399_v36 = vld [vmem:[%s4296_s0 + $0x508] sm:$0x3f] }
 0x437   :  { %v152_v48 = vld [vmem:[%s4298_s2 + $0x450] sm:$0xff] }
 0x438   :  { %1270 = vst.msk [vmem:[%s4299_s3 + $0x430] sm:$0xff] %vm1134_vm0, %v1044_v41  ;;  %v1048_v61 = vadd.f32 %v824_v52, %v152_v48  ;;  %v611_v41 = vld [vmem:[%s4297_s1 + $0x4a8] sm:$0x3f] }
 0x439   :  { %v835_v43 = vadd.f32 %v611_v41, %v387_v40  ;;  %v400_v41 = vld [vmem:[%s4296_s0 + $0x510] sm:$0xff] }
 0x43f   :  { %v153_v53 = vld [vmem:[%s4298_s2 + $0x458] sm:$0x3f] }
 0x440   :  { %1271 = vst.msk [vmem:[%s4299_s3 + $0x438] sm:$0x3f] %vm1136_vm1, %v1045_v46  ;;  %v1049_v2 = vadd.f32 %v825_v57, %v153_v53  ;;  %v612_v46 = vld [vmem:[%s4297_s1 + $0x4b0] sm:$0xff] }
 0x441   :  { %v836_v48 = vadd.f32 %v612_v46, %v388_v45  ;;  %v401_v46 = vld [vmem:[%s4296_s0 + $0x518] sm:$0x3f] }
 0x447   :  { %v154_v58 = vld [vmem:[%s4298_s2 + $0x460] sm:$0xff] }
 0x448   :  { %1272 = vst.msk [vmem:[%s4299_s3 + $0x440] sm:$0xff] %vm1134_vm0, %v1046_v51  ;;  %v1050_v7 = vadd.f32 %v826_v62, %v154_v58  ;;  %v613_v51 = vld [vmem:[%s4297_s1 + $0x4b8] sm:$0x3f] }
 0x449   :  { %v837_v53 = vadd.f32 %v613_v51, %v389_v50  ;;  %v402_v51 = vld [vmem:[%s4296_s0 + $0x520] sm:$0xff] }
 0x44f   :  { %v155_v63 = vld [vmem:[%s4298_s2 + $0x468] sm:$0x3f] }
 0x450   :  { %1273 = vst.msk [vmem:[%s4299_s3 + $0x448] sm:$0x3f] %vm1136_vm1, %v1047_v56  ;;  %v1051_v12 = vadd.f32 %v827_v3, %v155_v63  ;;  %v614_v56 = vld [vmem:[%s4297_s1 + $0x4c0] sm:$0xff] }
 0x451   :  { %v838_v58 = vadd.f32 %v614_v56, %v390_v55  ;;  %v403_v56 = vld [vmem:[%s4296_s0 + $0x528] sm:$0x3f] }
 0x457   :  { %v156_v4 = vld [vmem:[%s4298_s2 + $0x470] sm:$0xff] }
 0x458   :  { %1274 = vst.msk [vmem:[%s4299_s3 + $0x450] sm:$0xff] %vm1134_vm0, %v1048_v61  ;;  %v1052_v17 = vadd.f32 %v828_v8, %v156_v4  ;;  %v615_v61 = vld [vmem:[%s4297_s1 + $0x4c8] sm:$0x3f] }
 0x459   :  { %v839_v63 = vadd.f32 %v615_v61, %v391_v60  ;;  %v404_v61 = vld [vmem:[%s4296_s0 + $0x530] sm:$0xff] }
 0x45f   :  { %v157_v9 = vld [vmem:[%s4298_s2 + $0x478] sm:$0x3f] }
 0x460   :  { %1275 = vst.msk [vmem:[%s4299_s3 + $0x458] sm:$0x3f] %vm1136_vm1, %v1049_v2  ;;  %v1053_v22 = vadd.f32 %v829_v13, %v157_v9  ;;  %v616_v2 = vld [vmem:[%s4297_s1 + $0x4d0] sm:$0xff] }
 0x461   :  { %v840_v4 = vadd.f32 %v616_v2, %v392_v1  ;;  %v405_v2 = vld [vmem:[%s4296_s0 + $0x538] sm:$0x3f] }
 0x467   :  { %v158_v14 = vld [vmem:[%s4298_s2 + $0x480] sm:$0xff] }
 0x468   :  { %1276 = vst.msk [vmem:[%s4299_s3 + $0x460] sm:$0xff] %vm1134_vm0, %v1050_v7  ;;  %v1054_v27 = vadd.f32 %v830_v18, %v158_v14  ;;  %v617_v7 = vld [vmem:[%s4297_s1 + $0x4d8] sm:$0x3f] }
 0x469   :  { %v841_v9 = vadd.f32 %v617_v7, %v393_v6  ;;  %v406_v7 = vld [vmem:[%s4296_s0 + $0x540] sm:$0xff] }
 0x46f   :  { %v159_v19 = vld [vmem:[%s4298_s2 + $0x488] sm:$0x3f] }
 0x470   :  { %1277 = vst.msk [vmem:[%s4299_s3 + $0x468] sm:$0x3f] %vm1136_vm1, %v1051_v12  ;;  %v1055_v32 = vadd.f32 %v831_v23, %v159_v19  ;;  %v618_v12 = vld [vmem:[%s4297_s1 + $0x4e0] sm:$0xff] }
 0x471   :  { %v842_v14 = vadd.f32 %v618_v12, %v394_v11  ;;  %v407_v12 = vld [vmem:[%s4296_s0 + $0x548] sm:$0x3f] }
 0x477   :  { %v160_v24 = vld [vmem:[%s4298_s2 + $0x490] sm:$0xff] }
 0x478   :  { %1278 = vst.msk [vmem:[%s4299_s3 + $0x470] sm:$0xff] %vm1134_vm0, %v1052_v17  ;;  %v1056_v37 = vadd.f32 %v832_v28, %v160_v24  ;;  %v619_v17 = vld [vmem:[%s4297_s1 + $0x4e8] sm:$0x3f] }
 0x479   :  { %v843_v19 = vadd.f32 %v619_v17, %v395_v16  ;;  %v408_v17 = vld [vmem:[%s4296_s0 + $0x550] sm:$0xff] }
 0x47f   :  { %v161_v29 = vld [vmem:[%s4298_s2 + $0x498] sm:$0x3f] }
 0x480   :  { %1279 = vst.msk [vmem:[%s4299_s3 + $0x478] sm:$0x3f] %vm1136_vm1, %v1053_v22  ;;  %v1057_v42 = vadd.f32 %v833_v33, %v161_v29  ;;  %v620_v22 = vld [vmem:[%s4297_s1 + $0x4f0] sm:$0xff] }
 0x481   :  { %v844_v24 = vadd.f32 %v620_v22, %v396_v21  ;;  %v409_v22 = vld [vmem:[%s4296_s0 + $0x558] sm:$0x3f] }
 0x487   :  { %v162_v34 = vld [vmem:[%s4298_s2 + $0x4a0] sm:$0xff] }
 0x488   :  { %1280 = vst.msk [vmem:[%s4299_s3 + $0x480] sm:$0xff] %vm1134_vm0, %v1054_v27  ;;  %v1058_v47 = vadd.f32 %v834_v38, %v162_v34  ;;  %v621_v27 = vld [vmem:[%s4297_s1 + $0x4f8] sm:$0x3f] }
 0x489   :  { %v845_v29 = vadd.f32 %v621_v27, %v397_v26  ;;  %v410_v27 = vld [vmem:[%s4296_s0 + $0x560] sm:$0xff] }
 0x48f   :  { %v163_v39 = vld [vmem:[%s4298_s2 + $0x4a8] sm:$0x3f] }
 0x490   :  { %1281 = vst.msk [vmem:[%s4299_s3 + $0x488] sm:$0x3f] %vm1136_vm1, %v1055_v32  ;;  %v1059_v52 = vadd.f32 %v835_v43, %v163_v39  ;;  %v622_v32 = vld [vmem:[%s4297_s1 + $0x500] sm:$0xff] }
 0x491   :  { %v846_v34 = vadd.f32 %v622_v32, %v398_v31  ;;  %v411_v32 = vld [vmem:[%s4296_s0 + $0x568] sm:$0x3f] }
 0x497   :  { %v164_v44 = vld [vmem:[%s4298_s2 + $0x4b0] sm:$0xff] }
 0x498   :  { %1282 = vst.msk [vmem:[%s4299_s3 + $0x490] sm:$0xff] %vm1134_vm0, %v1056_v37  ;;  %v1060_v57 = vadd.f32 %v836_v48, %v164_v44  ;;  %v623_v37 = vld [vmem:[%s4297_s1 + $0x508] sm:$0x3f] }
 0x499   :  { %v847_v39 = vadd.f32 %v623_v37, %v399_v36  ;;  %v412_v37 = vld [vmem:[%s4296_s0 + $0x570] sm:$0xff] }
 0x49f   :  { %v165_v49 = vld [vmem:[%s4298_s2 + $0x4b8] sm:$0x3f] }
 0x4a0   :  { %1283 = vst.msk [vmem:[%s4299_s3 + $0x498] sm:$0x3f] %vm1136_vm1, %v1057_v42  ;;  %v1061_v62 = vadd.f32 %v837_v53, %v165_v49  ;;  %v624_v42 = vld [vmem:[%s4297_s1 + $0x510] sm:$0xff] }
 0x4a1   :  { %v848_v44 = vadd.f32 %v624_v42, %v400_v41  ;;  %v413_v42 = vld [vmem:[%s4296_s0 + $0x578] sm:$0x3f] }
 0x4a7   :  { %v166_v54 = vld [vmem:[%s4298_s2 + $0x4c0] sm:$0xff] }
 0x4a8   :  { %1284 = vst.msk [vmem:[%s4299_s3 + $0x4a0] sm:$0xff] %vm1134_vm0, %v1058_v47  ;;  %v1062_v3 = vadd.f32 %v838_v58, %v166_v54  ;;  %v625_v47 = vld [vmem:[%s4297_s1 + $0x518] sm:$0x3f] }
 0x4a9   :  { %v849_v49 = vadd.f32 %v625_v47, %v401_v46  ;;  %v414_v47 = vld [vmem:[%s4296_s0 + $0x580] sm:$0xff] }
 0x4af   :  { %v167_v59 = vld [vmem:[%s4298_s2 + $0x4c8] sm:$0x3f] }
 0x4b0   :  { %1285 = vst.msk [vmem:[%s4299_s3 + $0x4a8] sm:$0x3f] %vm1136_vm1, %v1059_v52  ;;  %v1063_v8 = vadd.f32 %v839_v63, %v167_v59  ;;  %v626_v52 = vld [vmem:[%s4297_s1 + $0x520] sm:$0xff] }
 0x4b1   :  { %v850_v54 = vadd.f32 %v626_v52, %v402_v51  ;;  %v415_v52 = vld [vmem:[%s4296_s0 + $0x588] sm:$0x3f] }
 0x4b7   :  { %v168_v0 = vld [vmem:[%s4298_s2 + $0x4d0] sm:$0xff] }
 0x4b8   :  { %1286 = vst.msk [vmem:[%s4299_s3 + $0x4b0] sm:$0xff] %vm1134_vm0, %v1060_v57  ;;  %v1064_v13 = vadd.f32 %v840_v4, %v168_v0  ;;  %v627_v57 = vld [vmem:[%s4297_s1 + $0x528] sm:$0x3f] }
 0x4b9   :  { %v851_v59 = vadd.f32 %v627_v57, %v403_v56  ;;  %v416_v57 = vld [vmem:[%s4296_s0 + $0x590] sm:$0xff] }
 0x4bf   :  { %v169_v5 = vld [vmem:[%s4298_s2 + $0x4d8] sm:$0x3f] }
 0x4c0   :  { %1287 = vst.msk [vmem:[%s4299_s3 + $0x4b8] sm:$0x3f] %vm1136_vm1, %v1061_v62  ;;  %v1065_v18 = vadd.f32 %v841_v9, %v169_v5  ;;  %v628_v62 = vld [vmem:[%s4297_s1 + $0x530] sm:$0xff] }
 0x4c1   :  { %v852_v0 = vadd.f32 %v628_v62, %v404_v61  ;;  %v417_v62 = vld [vmem:[%s4296_s0 + $0x598] sm:$0x3f] }
 0x4c7   :  { %v170_v10 = vld [vmem:[%s4298_s2 + $0x4e0] sm:$0xff] }
 0x4c8   :  { %1288 = vst.msk [vmem:[%s4299_s3 + $0x4c0] sm:$0xff] %vm1134_vm0, %v1062_v3  ;;  %v1066_v23 = vadd.f32 %v842_v14, %v170_v10  ;;  %v629_v3 = vld [vmem:[%s4297_s1 + $0x538] sm:$0x3f] }
 0x4c9   :  { %v853_v5 = vadd.f32 %v629_v3, %v405_v2  ;;  %v418_v3 = vld [vmem:[%s4296_s0 + $0x5a0] sm:$0xff] }
 0x4cf   :  { %v171_v15 = vld [vmem:[%s4298_s2 + $0x4e8] sm:$0x3f] }
 0x4d0   :  { %1289 = vst.msk [vmem:[%s4299_s3 + $0x4c8] sm:$0x3f] %vm1136_vm1, %v1063_v8  ;;  %v1067_v28 = vadd.f32 %v843_v19, %v171_v15  ;;  %v630_v8 = vld [vmem:[%s4297_s1 + $0x540] sm:$0xff] }
 0x4d1   :  { %v854_v10 = vadd.f32 %v630_v8, %v406_v7  ;;  %v419_v8 = vld [vmem:[%s4296_s0 + $0x5a8] sm:$0x3f] }
 0x4d7   :  { %v172_v20 = vld [vmem:[%s4298_s2 + $0x4f0] sm:$0xff] }
 0x4d8   :  { %1290 = vst.msk [vmem:[%s4299_s3 + $0x4d0] sm:$0xff] %vm1134_vm0, %v1064_v13  ;;  %v1068_v33 = vadd.f32 %v844_v24, %v172_v20  ;;  %v631_v13 = vld [vmem:[%s4297_s1 + $0x548] sm:$0x3f] }
 0x4d9   :  { %v855_v15 = vadd.f32 %v631_v13, %v407_v12  ;;  %v420_v13 = vld [vmem:[%s4296_s0 + $0x5b0] sm:$0xff] }
 0x4df   :  { %v173_v25 = vld [vmem:[%s4298_s2 + $0x4f8] sm:$0x3f] }
 0x4e0   :  { %1291 = vst.msk [vmem:[%s4299_s3 + $0x4d8] sm:$0x3f] %vm1136_vm1, %v1065_v18  ;;  %v1069_v38 = vadd.f32 %v845_v29, %v173_v25  ;;  %v632_v18 = vld [vmem:[%s4297_s1 + $0x550] sm:$0xff] }
 0x4e1   :  { %v856_v20 = vadd.f32 %v632_v18, %v408_v17  ;;  %v421_v18 = vld [vmem:[%s4296_s0 + $0x5b8] sm:$0x3f] }
 0x4e7   :  { %v174_v30 = vld [vmem:[%s4298_s2 + $0x500] sm:$0xff] }
 0x4e8   :  { %1292 = vst.msk [vmem:[%s4299_s3 + $0x4e0] sm:$0xff] %vm1134_vm0, %v1066_v23  ;;  %v1070_v43 = vadd.f32 %v846_v34, %v174_v30  ;;  %v633_v23 = vld [vmem:[%s4297_s1 + $0x558] sm:$0x3f] }
 0x4e9   :  { %v857_v25 = vadd.f32 %v633_v23, %v409_v22  ;;  %v422_v23 = vld [vmem:[%s4296_s0 + $0x5c0] sm:$0xff] }
 0x4ef   :  { %v175_v35 = vld [vmem:[%s4298_s2 + $0x508] sm:$0x3f] }
 0x4f0   :  { %1293 = vst.msk [vmem:[%s4299_s3 + $0x4e8] sm:$0x3f] %vm1136_vm1, %v1067_v28  ;;  %v1071_v48 = vadd.f32 %v847_v39, %v175_v35  ;;  %v634_v28 = vld [vmem:[%s4297_s1 + $0x560] sm:$0xff] }
 0x4f1   :  { %v858_v30 = vadd.f32 %v634_v28, %v410_v27  ;;  %v423_v28 = vld [vmem:[%s4296_s0 + $0x5c8] sm:$0x3f] }
 0x4f7   :  { %v176_v40 = vld [vmem:[%s4298_s2 + $0x510] sm:$0xff] }
 0x4f8   :  { %1294 = vst.msk [vmem:[%s4299_s3 + $0x4f0] sm:$0xff] %vm1134_vm0, %v1068_v33  ;;  %v1072_v53 = vadd.f32 %v848_v44, %v176_v40  ;;  %v635_v33 = vld [vmem:[%s4297_s1 + $0x568] sm:$0x3f] }
 0x4f9   :  { %v859_v35 = vadd.f32 %v635_v33, %v411_v32  ;;  %v424_v33 = vld [vmem:[%s4296_s0 + $0x5d0] sm:$0xff] }
 0x4ff   :  { %v177_v45 = vld [vmem:[%s4298_s2 + $0x518] sm:$0x3f] }
 0x500   :  { %1295 = vst.msk [vmem:[%s4299_s3 + $0x4f8] sm:$0x3f] %vm1136_vm1, %v1069_v38  ;;  %v1073_v58 = vadd.f32 %v849_v49, %v177_v45  ;;  %v636_v38 = vld [vmem:[%s4297_s1 + $0x570] sm:$0xff] }
 0x501   :  { %v860_v40 = vadd.f32 %v636_v38, %v412_v37  ;;  %v425_v38 = vld [vmem:[%s4296_s0 + $0x5d8] sm:$0x3f] }
 0x507   :  { %v178_v50 = vld [vmem:[%s4298_s2 + $0x520] sm:$0xff] }
 0x508   :  { %1296 = vst.msk [vmem:[%s4299_s3 + $0x500] sm:$0xff] %vm1134_vm0, %v1070_v43  ;;  %v1074_v63 = vadd.f32 %v850_v54, %v178_v50  ;;  %v637_v43 = vld [vmem:[%s4297_s1 + $0x578] sm:$0x3f] }
 0x509   :  { %v861_v45 = vadd.f32 %v637_v43, %v413_v42  ;;  %v426_v43 = vld [vmem:[%s4296_s0 + $0x5e0] sm:$0xff] }
 0x50f   :  { %v179_v55 = vld [vmem:[%s4298_s2 + $0x528] sm:$0x3f] }
 0x510   :  { %1297 = vst.msk [vmem:[%s4299_s3 + $0x508] sm:$0x3f] %vm1136_vm1, %v1071_v48  ;;  %v1075_v4 = vadd.f32 %v851_v59, %v179_v55  ;;  %v638_v48 = vld [vmem:[%s4297_s1 + $0x580] sm:$0xff] }
 0x511   :  { %v862_v50 = vadd.f32 %v638_v48, %v414_v47  ;;  %v427_v48 = vld [vmem:[%s4296_s0 + $0x5e8] sm:$0x3f] }
 0x517   :  { %v180_v60 = vld [vmem:[%s4298_s2 + $0x530] sm:$0xff] }
 0x518   :  { %1298 = vst.msk [vmem:[%s4299_s3 + $0x510] sm:$0xff] %vm1134_vm0, %v1072_v53  ;;  %v1076_v9 = vadd.f32 %v852_v0, %v180_v60  ;;  %v639_v53 = vld [vmem:[%s4297_s1 + $0x588] sm:$0x3f] }
 0x519   :  { %v863_v55 = vadd.f32 %v639_v53, %v415_v52  ;;  %v428_v53 = vld [vmem:[%s4296_s0 + $0x5f0] sm:$0xff] }
 0x51f   :  { %v181_v1 = vld [vmem:[%s4298_s2 + $0x538] sm:$0x3f] }
 0x520   :  { %1299 = vst.msk [vmem:[%s4299_s3 + $0x518] sm:$0x3f] %vm1136_vm1, %v1073_v58  ;;  %v1077_v14 = vadd.f32 %v853_v5, %v181_v1  ;;  %v640_v58 = vld [vmem:[%s4297_s1 + $0x590] sm:$0xff] }
 0x521   :  { %v864_v60 = vadd.f32 %v640_v58, %v416_v57  ;;  %v429_v58 = vld [vmem:[%s4296_s0 + $0x5f8] sm:$0x3f] }
 0x527   :  { %v182_v6 = vld [vmem:[%s4298_s2 + $0x540] sm:$0xff] }
 0x528   :  { %1300 = vst.msk [vmem:[%s4299_s3 + $0x520] sm:$0xff] %vm1134_vm0, %v1074_v63  ;;  %v1078_v19 = vadd.f32 %v854_v10, %v182_v6  ;;  %v641_v63 = vld [vmem:[%s4297_s1 + $0x598] sm:$0x3f] }
 0x529   :  { %v865_v1 = vadd.f32 %v641_v63, %v417_v62  ;;  %v430_v63 = vld [vmem:[%s4296_s0 + $0x600] sm:$0xff] }
 0x52f   :  { %v183_v11 = vld [vmem:[%s4298_s2 + $0x548] sm:$0x3f] }
 0x530   :  { %1301 = vst.msk [vmem:[%s4299_s3 + $0x528] sm:$0x3f] %vm1136_vm1, %v1075_v4  ;;  %v1079_v24 = vadd.f32 %v855_v15, %v183_v11  ;;  %v642_v4 = vld [vmem:[%s4297_s1 + $0x5a0] sm:$0xff] }
 0x531   :  { %v866_v6 = vadd.f32 %v642_v4, %v418_v3  ;;  %v431_v4 = vld [vmem:[%s4296_s0 + $0x608] sm:$0x3f] }
 0x537   :  { %v184_v16 = vld [vmem:[%s4298_s2 + $0x550] sm:$0xff] }
 0x538   :  { %1302 = vst.msk [vmem:[%s4299_s3 + $0x530] sm:$0xff] %vm1134_vm0, %v1076_v9  ;;  %v1080_v29 = vadd.f32 %v856_v20, %v184_v16  ;;  %v643_v9 = vld [vmem:[%s4297_s1 + $0x5a8] sm:$0x3f] }
 0x539   :  { %v867_v11 = vadd.f32 %v643_v9, %v419_v8  ;;  %v432_v9 = vld [vmem:[%s4296_s0 + $0x610] sm:$0xff] }
 0x53f   :  { %v185_v21 = vld [vmem:[%s4298_s2 + $0x558] sm:$0x3f] }
 0x540   :  { %1303 = vst.msk [vmem:[%s4299_s3 + $0x538] sm:$0x3f] %vm1136_vm1, %v1077_v14  ;;  %v1081_v34 = vadd.f32 %v857_v25, %v185_v21  ;;  %v644_v14 = vld [vmem:[%s4297_s1 + $0x5b0] sm:$0xff] }
 0x541   :  { %v868_v16 = vadd.f32 %v644_v14, %v420_v13  ;;  %v433_v14 = vld [vmem:[%s4296_s0 + $0x618] sm:$0x3f] }
 0x547   :  { %v186_v26 = vld [vmem:[%s4298_s2 + $0x560] sm:$0xff] }
 0x548   :  { %1304 = vst.msk [vmem:[%s4299_s3 + $0x540] sm:$0xff] %vm1134_vm0, %v1078_v19  ;;  %v1082_v39 = vadd.f32 %v858_v30, %v186_v26  ;;  %v645_v19 = vld [vmem:[%s4297_s1 + $0x5b8] sm:$0x3f] }
 0x549   :  { %v869_v21 = vadd.f32 %v645_v19, %v421_v18  ;;  %v434_v19 = vld [vmem:[%s4296_s0 + $0x620] sm:$0xff] }
 0x54f   :  { %v187_v31 = vld [vmem:[%s4298_s2 + $0x568] sm:$0x3f] }
 0x550   :  { %1305 = vst.msk [vmem:[%s4299_s3 + $0x548] sm:$0x3f] %vm1136_vm1, %v1079_v24  ;;  %v1083_v44 = vadd.f32 %v859_v35, %v187_v31  ;;  %v646_v24 = vld [vmem:[%s4297_s1 + $0x5c0] sm:$0xff] }
 0x551   :  { %v870_v26 = vadd.f32 %v646_v24, %v422_v23  ;;  %v435_v24 = vld [vmem:[%s4296_s0 + $0x628] sm:$0x3f] }
 0x557   :  { %v188_v36 = vld [vmem:[%s4298_s2 + $0x570] sm:$0xff] }
 0x558   :  { %1306 = vst.msk [vmem:[%s4299_s3 + $0x550] sm:$0xff] %vm1134_vm0, %v1080_v29  ;;  %v1084_v49 = vadd.f32 %v860_v40, %v188_v36  ;;  %v647_v29 = vld [vmem:[%s4297_s1 + $0x5c8] sm:$0x3f] }
 0x559   :  { %v871_v31 = vadd.f32 %v647_v29, %v423_v28  ;;  %v436_v29 = vld [vmem:[%s4296_s0 + $0x630] sm:$0xff] }
 0x55f   :  { %v189_v41 = vld [vmem:[%s4298_s2 + $0x578] sm:$0x3f] }
 0x560   :  { %1307 = vst.msk [vmem:[%s4299_s3 + $0x558] sm:$0x3f] %vm1136_vm1, %v1081_v34  ;;  %v1085_v54 = vadd.f32 %v861_v45, %v189_v41  ;;  %v648_v34 = vld [vmem:[%s4297_s1 + $0x5d0] sm:$0xff] }
 0x561   :  { %v872_v36 = vadd.f32 %v648_v34, %v424_v33  ;;  %v437_v34 = vld [vmem:[%s4296_s0 + $0x638] sm:$0x3f] }
 0x567   :  { %v190_v46 = vld [vmem:[%s4298_s2 + $0x580] sm:$0xff] }
 0x568   :  { %1308 = vst.msk [vmem:[%s4299_s3 + $0x560] sm:$0xff] %vm1134_vm0, %v1082_v39  ;;  %v1086_v59 = vadd.f32 %v862_v50, %v190_v46  ;;  %v649_v39 = vld [vmem:[%s4297_s1 + $0x5d8] sm:$0x3f] }
 0x569   :  { %v873_v41 = vadd.f32 %v649_v39, %v425_v38  ;;  %v438_v39 = vld [vmem:[%s4296_s0 + $0x640] sm:$0xff] }
 0x56f   :  { %v191_v51 = vld [vmem:[%s4298_s2 + $0x588] sm:$0x3f] }
 0x570   :  { %1309 = vst.msk [vmem:[%s4299_s3 + $0x568] sm:$0x3f] %vm1136_vm1, %v1083_v44  ;;  %v1087_v0 = vadd.f32 %v863_v55, %v191_v51  ;;  %v650_v44 = vld [vmem:[%s4297_s1 + $0x5e0] sm:$0xff] }
 0x571   :  { %v874_v46 = vadd.f32 %v650_v44, %v426_v43  ;;  %v439_v44 = vld [vmem:[%s4296_s0 + $0x648] sm:$0x3f] }
 0x577   :  { %v192_v56 = vld [vmem:[%s4298_s2 + $0x590] sm:$0xff] }
 0x578   :  { %1310 = vst.msk [vmem:[%s4299_s3 + $0x570] sm:$0xff] %vm1134_vm0, %v1084_v49  ;;  %v1088_v5 = vadd.f32 %v864_v60, %v192_v56  ;;  %v651_v49 = vld [vmem:[%s4297_s1 + $0x5e8] sm:$0x3f] }
 0x579   :  { %v875_v51 = vadd.f32 %v651_v49, %v427_v48  ;;  %v440_v49 = vld [vmem:[%s4296_s0 + $0x650] sm:$0xff] }
 0x57f   :  { %v193_v61 = vld [vmem:[%s4298_s2 + $0x598] sm:$0x3f] }
 0x580   :  { %1311 = vst.msk [vmem:[%s4299_s3 + $0x578] sm:$0x3f] %vm1136_vm1, %v1085_v54  ;;  %v1089_v10 = vadd.f32 %v865_v1, %v193_v61  ;;  %v652_v54 = vld [vmem:[%s4297_s1 + $0x5f0] sm:$0xff] }
 0x581   :  { %v876_v56 = vadd.f32 %v652_v54, %v428_v53  ;;  %v441_v54 = vld [vmem:[%s4296_s0 + $0x658] sm:$0x3f] }
 0x587   :  { %v194_v2 = vld [vmem:[%s4298_s2 + $0x5a0] sm:$0xff] }
 0x588   :  { %1312 = vst.msk [vmem:[%s4299_s3 + $0x580] sm:$0xff] %vm1134_vm0, %v1086_v59  ;;  %v1090_v15 = vadd.f32 %v866_v6, %v194_v2  ;;  %v653_v59 = vld [vmem:[%s4297_s1 + $0x5f8] sm:$0x3f] }
 0x589   :  { %v877_v61 = vadd.f32 %v653_v59, %v429_v58  ;;  %v442_v59 = vld [vmem:[%s4296_s0 + $0x660] sm:$0xff] }
 0x58f   :  { %v195_v7 = vld [vmem:[%s4298_s2 + $0x5a8] sm:$0x3f] }
 0x590   :  { %1313 = vst.msk [vmem:[%s4299_s3 + $0x588] sm:$0x3f] %vm1136_vm1, %v1087_v0  ;;  %v1091_v20 = vadd.f32 %v867_v11, %v195_v7  ;;  %v654_v0 = vld [vmem:[%s4297_s1 + $0x600] sm:$0xff] }
 0x591   :  { %v878_v2 = vadd.f32 %v654_v0, %v430_v63  ;;  %v443_v0 = vld [vmem:[%s4296_s0 + $0x668] sm:$0x3f] }
 0x597   :  { %v196_v12 = vld [vmem:[%s4298_s2 + $0x5b0] sm:$0xff] }
 0x598   :  { %1314 = vst.msk [vmem:[%s4299_s3 + $0x590] sm:$0xff] %vm1134_vm0, %v1088_v5  ;;  %v1092_v25 = vadd.f32 %v868_v16, %v196_v12  ;;  %v655_v5 = vld [vmem:[%s4297_s1 + $0x608] sm:$0x3f] }
 0x599   :  { %v879_v7 = vadd.f32 %v655_v5, %v431_v4  ;;  %v444_v5 = vld [vmem:[%s4296_s0 + $0x670] sm:$0xff] }
 0x59f   :  { %v197_v17 = vld [vmem:[%s4298_s2 + $0x5b8] sm:$0x3f] }
 0x5a0   :  { %1315 = vst.msk [vmem:[%s4299_s3 + $0x598] sm:$0x3f] %vm1136_vm1, %v1089_v10  ;;  %v1093_v30 = vadd.f32 %v869_v21, %v197_v17  ;;  %v656_v10 = vld [vmem:[%s4297_s1 + $0x610] sm:$0xff] }
 0x5a1   :  { %v880_v12 = vadd.f32 %v656_v10, %v432_v9  ;;  %v445_v10 = vld [vmem:[%s4296_s0 + $0x678] sm:$0x3f] }
 0x5a7   :  { %v198_v22 = vld [vmem:[%s4298_s2 + $0x5c0] sm:$0xff] }
 0x5a8   :  { %1316 = vst.msk [vmem:[%s4299_s3 + $0x5a0] sm:$0xff] %vm1134_vm0, %v1090_v15  ;;  %v1094_v35 = vadd.f32 %v870_v26, %v198_v22  ;;  %v657_v15 = vld [vmem:[%s4297_s1 + $0x618] sm:$0x3f] }
 0x5a9   :  { %v881_v17 = vadd.f32 %v657_v15, %v433_v14  ;;  %v446_v15 = vld [vmem:[%s4296_s0 + $0x680] sm:$0xff] }
 0x5af   :  { %v199_v27 = vld [vmem:[%s4298_s2 + $0x5c8] sm:$0x3f] }
 0x5b0   :  { %1317 = vst.msk [vmem:[%s4299_s3 + $0x5a8] sm:$0x3f] %vm1136_vm1, %v1091_v20  ;;  %v1095_v40 = vadd.f32 %v871_v31, %v199_v27  ;;  %v658_v20 = vld [vmem:[%s4297_s1 + $0x620] sm:$0xff] }
 0x5b1   :  { %v882_v22 = vadd.f32 %v658_v20, %v434_v19  ;;  %v447_v20 = vld [vmem:[%s4296_s0 + $0x688] sm:$0x3f] }
 0x5b7   :  { %v200_v32 = vld [vmem:[%s4298_s2 + $0x5d0] sm:$0xff] }
 0x5b8   :  { %1318 = vst.msk [vmem:[%s4299_s3 + $0x5b0] sm:$0xff] %vm1134_vm0, %v1092_v25  ;;  %v1096_v45 = vadd.f32 %v872_v36, %v200_v32  ;;  %v659_v25 = vld [vmem:[%s4297_s1 + $0x628] sm:$0x3f] }
 0x5b9   :  { %v883_v27 = vadd.f32 %v659_v25, %v435_v24  ;;  %v448_v25 = vld [vmem:[%s4296_s0 + $0x690] sm:$0xff] }
 0x5bf   :  { %v201_v37 = vld [vmem:[%s4298_s2 + $0x5d8] sm:$0x3f] }
 0x5c0   :  { %1319 = vst.msk [vmem:[%s4299_s3 + $0x5b8] sm:$0x3f] %vm1136_vm1, %v1093_v30  ;;  %v1097_v50 = vadd.f32 %v873_v41, %v201_v37  ;;  %v660_v30 = vld [vmem:[%s4297_s1 + $0x630] sm:$0xff] }
 0x5c1   :  { %v884_v32 = vadd.f32 %v660_v30, %v436_v29  ;;  %v449_v30 = vld [vmem:[%s4296_s0 + $0x698] sm:$0x3f] }
 0x5c7   :  { %v202_v42 = vld [vmem:[%s4298_s2 + $0x5e0] sm:$0xff] }
 0x5c8   :  { %1320 = vst.msk [vmem:[%s4299_s3 + $0x5c0] sm:$0xff] %vm1134_vm0, %v1094_v35  ;;  %v1098_v55 = vadd.f32 %v874_v46, %v202_v42  ;;  %v661_v35 = vld [vmem:[%s4297_s1 + $0x638] sm:$0x3f] }
 0x5c9   :  { %v885_v37 = vadd.f32 %v661_v35, %v437_v34  ;;  %v450_v35 = vld [vmem:[%s4296_s0 + $0x6a0] sm:$0xff] }
 0x5cf   :  { %v203_v47 = vld [vmem:[%s4298_s2 + $0x5e8] sm:$0x3f] }
 0x5d0   :  { %1321 = vst.msk [vmem:[%s4299_s3 + $0x5c8] sm:$0x3f] %vm1136_vm1, %v1095_v40  ;;  %v1099_v60 = vadd.f32 %v875_v51, %v203_v47  ;;  %v662_v40 = vld [vmem:[%s4297_s1 + $0x640] sm:$0xff] }
 0x5d1   :  { %v886_v42 = vadd.f32 %v662_v40, %v438_v39  ;;  %v451_v40 = vld [vmem:[%s4296_s0 + $0x6a8] sm:$0x3f] }
 0x5d7   :  { %v204_v52 = vld [vmem:[%s4298_s2 + $0x5f0] sm:$0xff] }
 0x5d8   :  { %1322 = vst.msk [vmem:[%s4299_s3 + $0x5d0] sm:$0xff] %vm1134_vm0, %v1096_v45  ;;  %v1100_v1 = vadd.f32 %v876_v56, %v204_v52  ;;  %v663_v45 = vld [vmem:[%s4297_s1 + $0x648] sm:$0x3f] }
 0x5d9   :  { %v887_v47 = vadd.f32 %v663_v45, %v439_v44  ;;  %v452_v45 = vld [vmem:[%s4296_s0 + $0x6b0] sm:$0xff] }
 0x5df   :  { %v205_v57 = vld [vmem:[%s4298_s2 + $0x5f8] sm:$0x3f] }
 0x5e0   :  { %1323 = vst.msk [vmem:[%s4299_s3 + $0x5d8] sm:$0x3f] %vm1136_vm1, %v1097_v50  ;;  %v1101_v6 = vadd.f32 %v877_v61, %v205_v57  ;;  %v664_v50 = vld [vmem:[%s4297_s1 + $0x650] sm:$0xff] }
 0x5e1   :  { %v888_v52 = vadd.f32 %v664_v50, %v440_v49  ;;  %v453_v50 = vld [vmem:[%s4296_s0 + $0x6b8] sm:$0x3f] }
 0x5e7   :  { %v206_v62 = vld [vmem:[%s4298_s2 + $0x600] sm:$0xff] }
 0x5e8   :  { %1324 = vst.msk [vmem:[%s4299_s3 + $0x5e0] sm:$0xff] %vm1134_vm0, %v1098_v55  ;;  %v1102_v11 = vadd.f32 %v878_v2, %v206_v62  ;;  %v665_v55 = vld [vmem:[%s4297_s1 + $0x658] sm:$0x3f] }
 0x5e9   :  { %v889_v57 = vadd.f32 %v665_v55, %v441_v54  ;;  %v454_v55 = vld [vmem:[%s4296_s0 + $0x6c0] sm:$0xff] }
 0x5ef   :  { %v207_v3 = vld [vmem:[%s4298_s2 + $0x608] sm:$0x3f] }
 0x5f0   :  { %1325 = vst.msk [vmem:[%s4299_s3 + $0x5e8] sm:$0x3f] %vm1136_vm1, %v1099_v60  ;;  %v1103_v16 = vadd.f32 %v879_v7, %v207_v3  ;;  %v666_v60 = vld [vmem:[%s4297_s1 + $0x660] sm:$0xff] }
 0x5f1   :  { %v890_v62 = vadd.f32 %v666_v60, %v442_v59  ;;  %v455_v60 = vld [vmem:[%s4296_s0 + $0x6c8] sm:$0x3f] }
 0x5f7   :  { %v208_v8 = vld [vmem:[%s4298_s2 + $0x610] sm:$0xff] }
 0x5f8   :  { %1326 = vst.msk [vmem:[%s4299_s3 + $0x5f0] sm:$0xff] %vm1134_vm0, %v1100_v1  ;;  %v1104_v21 = vadd.f32 %v880_v12, %v208_v8  ;;  %v667_v1 = vld [vmem:[%s4297_s1 + $0x668] sm:$0x3f] }
 0x5f9   :  { %v891_v3 = vadd.f32 %v667_v1, %v443_v0  ;;  %v456_v1 = vld [vmem:[%s4296_s0 + $0x6d0] sm:$0xff] }
 0x5ff   :  { %v209_v13 = vld [vmem:[%s4298_s2 + $0x618] sm:$0x3f] }
 0x600   :  { %1327 = vst.msk [vmem:[%s4299_s3 + $0x5f8] sm:$0x3f] %vm1136_vm1, %v1101_v6  ;;  %v1105_v26 = vadd.f32 %v881_v17, %v209_v13  ;;  %v668_v6 = vld [vmem:[%s4297_s1 + $0x670] sm:$0xff] }
 0x601   :  { %v892_v8 = vadd.f32 %v668_v6, %v444_v5  ;;  %v457_v6 = vld [vmem:[%s4296_s0 + $0x6d8] sm:$0x3f] }
 0x607   :  { %v210_v18 = vld [vmem:[%s4298_s2 + $0x620] sm:$0xff] }
 0x608   :  { %1328 = vst.msk [vmem:[%s4299_s3 + $0x600] sm:$0xff] %vm1134_vm0, %v1102_v11  ;;  %v1106_v31 = vadd.f32 %v882_v22, %v210_v18  ;;  %v669_v11 = vld [vmem:[%s4297_s1 + $0x678] sm:$0x3f] }
 0x609   :  { %v893_v13 = vadd.f32 %v669_v11, %v445_v10  ;;  %v458_v11 = vld [vmem:[%s4296_s0 + $0x6e0] sm:$0xff] }
 0x60f   :  { %v211_v23 = vld [vmem:[%s4298_s2 + $0x628] sm:$0x3f] }
 0x610   :  { %1329 = vst.msk [vmem:[%s4299_s3 + $0x608] sm:$0x3f] %vm1136_vm1, %v1103_v16  ;;  %v1107_v36 = vadd.f32 %v883_v27, %v211_v23  ;;  %v670_v16 = vld [vmem:[%s4297_s1 + $0x680] sm:$0xff] }
 0x611   :  { %v894_v18 = vadd.f32 %v670_v16, %v446_v15  ;;  %v459_v16 = vld [vmem:[%s4296_s0 + $0x6e8] sm:$0x3f] }
 0x617   :  { %v212_v28 = vld [vmem:[%s4298_s2 + $0x630] sm:$0xff] }
 0x618   :  { %1330 = vst.msk [vmem:[%s4299_s3 + $0x610] sm:$0xff] %vm1134_vm0, %v1104_v21  ;;  %v1108_v41 = vadd.f32 %v884_v32, %v212_v28  ;;  %v671_v21 = vld [vmem:[%s4297_s1 + $0x688] sm:$0x3f] }
 0x619   :  { %v895_v23 = vadd.f32 %v671_v21, %v447_v20  ;;  %v460_v21 = vld [vmem:[%s4296_s0 + $0x6f0] sm:$0xff] }
 0x61f   :  { %v213_v33 = vld [vmem:[%s4298_s2 + $0x638] sm:$0x3f] }
 0x620   :  { %1331 = vst.msk [vmem:[%s4299_s3 + $0x618] sm:$0x3f] %vm1136_vm1, %v1105_v26  ;;  %v1109_v46 = vadd.f32 %v885_v37, %v213_v33  ;;  %v672_v26 = vld [vmem:[%s4297_s1 + $0x690] sm:$0xff] }
 0x621   :  { %v896_v28 = vadd.f32 %v672_v26, %v448_v25  ;;  %v461_v26 = vld [vmem:[%s4296_s0 + $0x6f8] sm:$0x3f] }
 0x627   :  { %v214_v38 = vld [vmem:[%s4298_s2 + $0x640] sm:$0xff] }
 0x628   :  { %1332 = vst.msk [vmem:[%s4299_s3 + $0x620] sm:$0xff] %vm1134_vm0, %v1106_v31  ;;  %v1110_v51 = vadd.f32 %v886_v42, %v214_v38  ;;  %v673_v31 = vld [vmem:[%s4297_s1 + $0x698] sm:$0x3f] }
 0x629   :  { %v897_v33 = vadd.f32 %v673_v31, %v449_v30 }
 0x62f   :  { %v215_v43 = vld [vmem:[%s4298_s2 + $0x648] sm:$0x3f] }
 0x630   :  { %1333 = vst.msk [vmem:[%s4299_s3 + $0x628] sm:$0x3f] %vm1136_vm1, %v1107_v36  ;;  %v1111_v56 = vadd.f32 %v887_v47, %v215_v43  ;;  %v674_v36 = vld [vmem:[%s4297_s1 + $0x6a0] sm:$0xff] }
 0x631   :  { %v898_v38 = vadd.f32 %v674_v36, %v450_v35 }
 0x637   :  { %v216_v48 = vld [vmem:[%s4298_s2 + $0x650] sm:$0xff] }
 0x638   :  { %1334 = vst.msk [vmem:[%s4299_s3 + $0x630] sm:$0xff] %vm1134_vm0, %v1108_v41  ;;  %v1112_v61 = vadd.f32 %v888_v52, %v216_v48  ;;  %v675_v41 = vld [vmem:[%s4297_s1 + $0x6a8] sm:$0x3f] }
 0x639   :  { %v899_v43 = vadd.f32 %v675_v41, %v451_v40 }
 0x63f   :  { %v217_v53 = vld [vmem:[%s4298_s2 + $0x658] sm:$0x3f] }
 0x640   :  { %1335 = vst.msk [vmem:[%s4299_s3 + $0x638] sm:$0x3f] %vm1136_vm1, %v1109_v46  ;;  %v1113_v2 = vadd.f32 %v889_v57, %v217_v53  ;;  %v676_v46 = vld [vmem:[%s4297_s1 + $0x6b0] sm:$0xff] }
 0x641   :  { %v900_v48 = vadd.f32 %v676_v46, %v452_v45 }
 0x647   :  { %v218_v58 = vld [vmem:[%s4298_s2 + $0x660] sm:$0xff] }
 0x648   :  { %1336 = vst.msk [vmem:[%s4299_s3 + $0x640] sm:$0xff] %vm1134_vm0, %v1110_v51  ;;  %v1114_v7 = vadd.f32 %v890_v62, %v218_v58  ;;  %v677_v51 = vld [vmem:[%s4297_s1 + $0x6b8] sm:$0x3f] }
 0x649   :  { %v901_v53 = vadd.f32 %v677_v51, %v453_v50 }
 0x64f   :  { %v219_v63 = vld [vmem:[%s4298_s2 + $0x668] sm:$0x3f] }
 0x650   :  { %1337 = vst.msk [vmem:[%s4299_s3 + $0x648] sm:$0x3f] %vm1136_vm1, %v1111_v56  ;;  %v1115_v12 = vadd.f32 %v891_v3, %v219_v63  ;;  %v678_v56 = vld [vmem:[%s4297_s1 + $0x6c0] sm:$0xff] }
 0x651   :  { %v902_v58 = vadd.f32 %v678_v56, %v454_v55 }
 0x657   :  { %v220_v4 = vld [vmem:[%s4298_s2 + $0x670] sm:$0xff] }
 0x658   :  { %1338 = vst.msk [vmem:[%s4299_s3 + $0x650] sm:$0xff] %vm1134_vm0, %v1112_v61  ;;  %v1116_v17 = vadd.f32 %v892_v8, %v220_v4  ;;  %v679_v61 = vld [vmem:[%s4297_s1 + $0x6c8] sm:$0x3f] }
 0x659   :  { %v903_v63 = vadd.f32 %v679_v61, %v455_v60 }
 0x65f   :  { %v221_v9 = vld [vmem:[%s4298_s2 + $0x678] sm:$0x3f] }
 0x660   :  { %1339 = vst.msk [vmem:[%s4299_s3 + $0x658] sm:$0x3f] %vm1136_vm1, %v1113_v2  ;;  %v1117_v22 = vadd.f32 %v893_v13, %v221_v9  ;;  %v680_v2 = vld [vmem:[%s4297_s1 + $0x6d0] sm:$0xff] }
 0x661   :  { %v904_v4 = vadd.f32 %v680_v2, %v456_v1 }
 0x667   :  { %v222_v14 = vld [vmem:[%s4298_s2 + $0x680] sm:$0xff] }
 0x668   :  { %1340 = vst.msk [vmem:[%s4299_s3 + $0x660] sm:$0xff] %vm1134_vm0, %v1114_v7  ;;  %v1118_v27 = vadd.f32 %v894_v18, %v222_v14  ;;  %v681_v7 = vld [vmem:[%s4297_s1 + $0x6d8] sm:$0x3f] }
 0x669   :  { %v905_v9 = vadd.f32 %v681_v7, %v457_v6 }
 0x66f   :  { %v223_v19 = vld [vmem:[%s4298_s2 + $0x688] sm:$0x3f] }
 0x670   :  { %1341 = vst.msk [vmem:[%s4299_s3 + $0x668] sm:$0x3f] %vm1136_vm1, %v1115_v12  ;;  %v1119_v32 = vadd.f32 %v895_v23, %v223_v19  ;;  %v682_v12 = vld [vmem:[%s4297_s1 + $0x6e0] sm:$0xff] }
 0x671   :  { %v906_v14 = vadd.f32 %v682_v12, %v458_v11 }
 0x677   :  { %v224_v24 = vld [vmem:[%s4298_s2 + $0x690] sm:$0xff] }
 0x678   :  { %1342 = vst.msk [vmem:[%s4299_s3 + $0x670] sm:$0xff] %vm1134_vm0, %v1116_v17  ;;  %v1120_v37 = vadd.f32 %v896_v28, %v224_v24  ;;  %v683_v17 = vld [vmem:[%s4297_s1 + $0x6e8] sm:$0x3f] }
 0x679   :  { %v907_v19 = vadd.f32 %v683_v17, %v459_v16 }
 0x67f   :  { %v225_v29 = vld [vmem:[%s4298_s2 + $0x698] sm:$0x3f] }
 0x680   :  { %1343 = vst.msk [vmem:[%s4299_s3 + $0x678] sm:$0x3f] %vm1136_vm1, %v1117_v22  ;;  %v1121_v42 = vadd.f32 %v897_v33, %v225_v29  ;;  %v684_v22 = vld [vmem:[%s4297_s1 + $0x6f0] sm:$0xff] }
 0x681   :  { %v908_v24 = vadd.f32 %v684_v22, %v460_v21 }
 0x687   :  { %v226_v34 = vld [vmem:[%s4298_s2 + $0x6a0] sm:$0xff] }
 0x688   :  { %1344 = vst.msk [vmem:[%s4299_s3 + $0x680] sm:$0xff] %vm1134_vm0, %v1118_v27  ;;  %v1122_v47 = vadd.f32 %v898_v38, %v226_v34  ;;  %v685_v27 = vld [vmem:[%s4297_s1 + $0x6f8] sm:$0x3f] }
 0x689   :  { %v909_v29 = vadd.f32 %v685_v27, %v461_v26 }
 0x68f   :  { %v227_v39 = vld [vmem:[%s4298_s2 + $0x6a8] sm:$0x3f] }
 0x690   :  { %1345 = vst.msk [vmem:[%s4299_s3 + $0x688] sm:$0x3f] %vm1136_vm1, %v1119_v32  ;;  %v1123_v52 = vadd.f32 %v899_v43, %v227_v39 }
 0x697   :  { %v228_v44 = vld [vmem:[%s4298_s2 + $0x6b0] sm:$0xff] }
 0x698   :  { %1346 = vst.msk [vmem:[%s4299_s3 + $0x690] sm:$0xff] %vm1134_vm0, %v1120_v37  ;;  %v1124_v57 = vadd.f32 %v900_v48, %v228_v44 }
 0x69f   :  { %v229_v49 = vld [vmem:[%s4298_s2 + $0x6b8] sm:$0x3f] }
 0x6a0   :  { %1347 = vst.msk [vmem:[%s4299_s3 + $0x698] sm:$0x3f] %vm1136_vm1, %v1121_v42  ;;  %v1125_v62 = vadd.f32 %v901_v53, %v229_v49 }
 0x6a7   :  { %v230_v54 = vld [vmem:[%s4298_s2 + $0x6c0] sm:$0xff] }
 0x6a8   :  { %1348 = vst.msk [vmem:[%s4299_s3 + $0x6a0] sm:$0xff] %vm1134_vm0, %v1122_v47  ;;  %v1126_v3 = vadd.f32 %v902_v58, %v230_v54 }
 0x6af   :  { %v231_v59 = vld [vmem:[%s4298_s2 + $0x6c8] sm:$0x3f] }
 0x6b0   :  { %1349 = vst.msk [vmem:[%s4299_s3 + $0x6a8] sm:$0x3f] %vm1136_vm1, %v1123_v52  ;;  %v1127_v8 = vadd.f32 %v903_v63, %v231_v59 }
 0x6b7   :  { %v232_v0 = vld [vmem:[%s4298_s2 + $0x6d0] sm:$0xff] }
 0x6b8   :  { %1350 = vst.msk [vmem:[%s4299_s3 + $0x6b0] sm:$0xff] %vm1134_vm0, %v1124_v57  ;;  %v1128_v13 = vadd.f32 %v904_v4, %v232_v0 }
 0x6bf   :  { %v233_v5 = vld [vmem:[%s4298_s2 + $0x6d8] sm:$0x3f] }
 0x6c0   :  { %1351 = vst.msk [vmem:[%s4299_s3 + $0x6b8] sm:$0x3f] %vm1136_vm1, %v1125_v62  ;;  %v1129_v18 = vadd.f32 %v905_v9, %v233_v5 }
 0x6c7   :  { %v234_v10 = vld [vmem:[%s4298_s2 + $0x6e0] sm:$0xff] }
 0x6c8   :  { %1352 = vst.msk [vmem:[%s4299_s3 + $0x6c0] sm:$0xff] %vm1134_vm0, %v1126_v3  ;;  %v1130_v23 = vadd.f32 %v906_v14, %v234_v10 }
 0x6cf   :  { %v235_v15 = vld [vmem:[%s4298_s2 + $0x6e8] sm:$0x3f] }
 0x6d0   :  { %1353 = vst.msk [vmem:[%s4299_s3 + $0x6c8] sm:$0x3f] %vm1136_vm1, %v1127_v8  ;;  %v1131_v28 = vadd.f32 %v907_v19, %v235_v15 }
 0x6d7   :  { %v236_v20 = vld [vmem:[%s4298_s2 + $0x6f0] sm:$0xff] }
 0x6d8   :  { %1354 = vst.msk [vmem:[%s4299_s3 + $0x6d0] sm:$0xff] %vm1134_vm0, %v1128_v13  ;;  %v1132_v30 = vadd.f32 %v908_v24, %v236_v20 }
 0x6df   :  { %v237_v25 = vld [vmem:[%s4298_s2 + $0x6f8] sm:$0x3f] }
 0x6e0   :  { %1355 = vst.msk [vmem:[%s4299_s3 + $0x6d8] sm:$0x3f] %vm1136_vm1, %v1129_v18  ;;  %1357 = vst.msk [vmem:[%s4299_s3 + $0x6e8] sm:$0x3f] %vm1136_vm1, %v1131_v28  ;;  %v1133_v31 = vadd.f32 %v909_v29, %v237_v25 }
 0x6e1   :  { %1356 = vst.msk [vmem:[%s4299_s3 + $0x6e0] sm:$0xff] %vm1134_vm0, %v1130_v23  ;;  %1358 = vst.msk [vmem:[%s4299_s3 + $0x6f0] sm:$0xff] %vm1134_vm0, %v1132_v30 }
 0x6e2   :  { %1359 = vst.msk [vmem:[%s4299_s3 + $0x6f8] sm:$0x3f] %vm1136_vm1, %v1133_v31 }

</bundles_post_ra>
